<compile_context>
chip_gen: v5e
topology: v5e:2x2
jax: 0.10.0
libtpu: 0.0.40
codegen_flags: <defaults>
</compile_context>

<pallas_src>
import functools

import jax
import jax.numpy as jnp
from jax.experimental import pallas as pl
from jax.experimental.pallas import tpu as pltpu


def _vote_head_kernel(x_ref, w1_ref, b1_ref, w2_ref, b2_ref, w3_ref, b3_ref,
                      head_ref, feat_ref, *, out_dim):
    # x_ref: (TN, Cin) f32 point-major seed features.  Cast to bf16 only for
    # the MXU; do not keep the bf16 value live past conv1.
    xb = x_ref[...].astype(jnp.bfloat16)

    # conv1 (1x1) + folded bn1 + relu    (bf16 MXU, f32 accumulate)
    h = jnp.dot(xb, w1_ref[...], preferred_element_type=jnp.float32) + b1_ref[...]
    h = jnp.maximum(h, 0.0).astype(jnp.bfloat16)

    # conv2 (1x1) + folded bn2 + relu
    h = jnp.dot(h, w2_ref[...], preferred_element_type=jnp.float32) + b2_ref[...]
    h = jnp.maximum(h, 0.0).astype(jnp.bfloat16)

    # conv3 (1x1) — fused weight: [:, :out_dim] residual head, [:, out_dim:] offset|score
    y = jnp.dot(h, w3_ref[...], preferred_element_type=jnp.float32) + b3_ref[...]

    resid = y[:, :out_dim]                       # (TN, out_dim) f32
    head = y[:, out_dim:out_dim + 4]             # (TN, 4) = offset(3) | score_logit(1)

    # sigmoid only on the score column; store offset|score packed as bf16.
    col = jax.lax.broadcasted_iota(jnp.int32, head.shape, 1)
    head_ref[...] = jnp.where(col == 3, jax.nn.sigmoid(head), head).astype(head_ref.dtype)

    # residual add (re-read the f32 input tile from VMEM) + L2 normalize (f32).
    vf = x_ref[...] + resid
    sumsq = jnp.sum(vf * vf, axis=-1, keepdims=True)
    inv = jax.lax.rsqrt(jnp.maximum(sumsq, 1e-24))   # == 1 / max(||vf||, 1e-12)
    feat_ref[...] = (vf * inv).astype(feat_ref.dtype)


def _fold_bn(w, b, gamma, beta, mean, var, eps=1e-5):
    """Fold eval-mode BatchNorm1d into the preceding 1x1 conv."""
    scale = gamma / jnp.sqrt(var + eps)
    return w * scale[:, None], scale * (b - mean) + beta


def _prep_params(params, out_dim):
    """Fold BN, fuse conv3 heads, cast matmul weights to bf16."""
    w1, b1 = _fold_bn(params["w1"], params["b1"],
                      params["g1"], params["be1"], params["m1"], params["v1"])
    w2, b2 = _fold_bn(params["w2"], params["b2"],
                      params["g2"], params["be2"], params["m2"], params["v2"])
    w3, b3 = params["w3"], params["b3"]

    # Fused conv3: residual columns first (lane-aligned at out_dim), then offset+score.
    w3f = jnp.concatenate([w3[4:], w3[:4]], axis=0)
    b3f = jnp.concatenate([b3[4:], b3[:4]])

    w1t = jnp.transpose(w1).astype(jnp.bfloat16)          # (in_dim, 256)
    w2t = jnp.transpose(w2).astype(jnp.bfloat16)          # (256, 256)
    w3t = jnp.transpose(w3f).astype(jnp.bfloat16)         # (256, out_dim + 4)
    b1_2d = b1.reshape(1, -1).astype(jnp.float32)
    b2_2d = b2.reshape(1, -1).astype(jnp.float32)
    b3_2d = b3f.reshape(1, -1).astype(jnp.float32)
    return w1t, b1_2d, w2t, b2_2d, w3t, b3_2d


def _pick_tile(total, max_tile=1024, min_steps=4):
    """Largest multiple-of-128 point tile <= max_tile leaving >= min_steps grid steps."""
    if total <= 128:
        return 128
    t = min(max_tile, max(128, pl.cdiv(total, min_steps)))
    return max(128, (t // 128) * 128)


def candidate_vote_v2(xyz, features_pm, params, out_dim, *, max_tile=1024):
    """Vote head.

    xyz:         (B, N, 3) float32 seed coordinates.
    features_pm: (B, N, in_dim) seed features, point-major (channels last).
                 (Equals PyTorch's seed_features.transpose(1, 2).)
    """
    B, N, _ = xyz.shape
    in_dim = features_pm.shape[-1]
    total = B * N

    TN = _pick_tile(total, max_tile=max_tile)
    P = pl.cdiv(total, TN) * TN                   # padded point count

    w1t, b1_2d, w2t, b2_2d, w3t, b3_2d = _prep_params(params, out_dim)

    # Flatten (B, N) -> one point axis (free reshape); pad only if needed.
    x = features_pm.reshape(total, in_dim).astype(jnp.float32)
    if P != total:
        x = jnp.pad(x, ((0, P - total), (0, 0)))

    grid = (P // TN,)
    full = lambda i: (0, 0)

    kernel = functools.partial(_vote_head_kernel, out_dim=out_dim)

    head_packed, vote_features = pl.pallas_call(
        kernel,
        grid=grid,
        in_specs=[
            pl.BlockSpec((TN, in_dim), lambda i: (i, 0)),   # seed features (f32)
            pl.BlockSpec(w1t.shape, full),
            pl.BlockSpec(b1_2d.shape, full),
            pl.BlockSpec(w2t.shape, full),
            pl.BlockSpec(b2_2d.shape, full),
            pl.BlockSpec(w3t.shape, full),
            pl.BlockSpec(b3_2d.shape, full),
        ],
        out_specs=[
            pl.BlockSpec((TN, 4), lambda i: (i, 0)),        # offset|score (bf16)
            pl.BlockSpec((TN, out_dim), lambda i: (i, 0)),  # vote_features (bf16)
        ],
        out_shape=(
            jax.ShapeDtypeStruct((P, 4), jnp.bfloat16),
            jax.ShapeDtypeStruct((P, out_dim), jnp.bfloat16),
        ),
        compiler_params=pltpu.CompilerParams(
            dimension_semantics=("parallel",),
            vmem_limit_bytes=48 * 1024 * 1024),
    )(x, w1t, b1_2d, w2t, b2_2d, w3t, b3_2d)

    head = head_packed[:total].reshape(B, N, 4).astype(jnp.float32)
    vote_features = vote_features[:total].reshape(B, N, out_dim)

    offset = head[..., 0:3]
    vote_scores = head[..., 3]
    vote_xyz = xyz + offset                       # trivial elementwise add, wrapper-side

    # Mirror the PyTorch module's trailing .squeeze() calls.
    return {
        "vote_xyz": jnp.squeeze(vote_xyz),
        "vote_xyz_offset": jnp.squeeze(offset),
        "vote_scores": jnp.squeeze(vote_scores),
        "vote_features": jnp.squeeze(vote_features),   # bf16 (f32 math, bf16 store)
    }


def _reference(xyz, features_pm, params, out_dim):
    """Pure-JAX reference mirroring the kernel's bf16/f32 numeric path."""
    w1t, b1_2d, w2t, b2_2d, w3t, b3_2d = _prep_params(params, out_dim)
    x32 = features_pm.astype(jnp.float32)
    xb = x32.astype(jnp.bfloat16)

    h = jnp.einsum("bnc,cd->bnd", xb, w1t,
                   preferred_element_type=jnp.float32) + b1_2d[None]
    h = jnp.maximum(h, 0.0).astype(jnp.bfloat16)
    h = jnp.einsum("bnc,cd->bnd", h, w2t,
                   preferred_element_type=jnp.float32) + b2_2d[None]
    h = jnp.maximum(h, 0.0).astype(jnp.bfloat16)
    y = jnp.einsum("bnc,cd->bnd", h, w3t,
                   preferred_element_type=jnp.float32) + b3_2d[None]

    resid = y[..., :out_dim]
    head = y[..., out_dim:out_dim + 4]
    offset = head[..., 0:3]
    score = jax.nn.sigmoid(head[..., 3])
    vf = x32 + resid
    sumsq = jnp.sum(vf * vf, axis=-1, keepdims=True)
    vf = vf * jax.lax.rsqrt(jnp.maximum(sumsq, 1e-24))
    return {
        "vote_xyz": jnp.squeeze(xyz + offset),
        "vote_xyz_offset": jnp.squeeze(offset),
        "vote_scores": jnp.squeeze(score),
        "vote_features": jnp.squeeze(vf),
    }


if __name__ == "__main__":
    key = jax.random.PRNGKey(0)
    B, N = 2, 256
    in_dim = 128            # fp2 output channel count feeding conv1
    out_dim = 128           # must equal seed feature dim for the residual add
    vote_c = 256

    ks = jax.random.split(key, 18)
    xyz = jax.random.normal(ks[0], (B, N, 3), jnp.float32)
    # Point-major seed features (B, N, in_dim) — producer-side layout.
    features_pm = 0.5 * jax.random.normal(ks[1], (B, N, in_dim), jnp.float32)

    def w(k, shape, s=0.05):
        return s * jax.random.normal(k, shape, jnp.float32)

    params = {
        # conv1 + bn1
        "w1": w(ks[2], (vote_c, in_dim)), "b1": w(ks[3], (vote_c,)),
        "g1": 1.0 + 0.1 * jax.random.normal(ks[4], (vote_c,), jnp.float32),
        "be1": w(ks[5], (vote_c,)),
        "m1": w(ks[6], (vote_c,)),
        "v1": 1.0 + 0.1 * jnp.abs(jax.random.normal(ks[7], (vote_c,), jnp.float32)),
        # conv2 + bn2
        "w2": w(ks[8], (vote_c, vote_c)), "b2": w(ks[9], (vote_c,)),
        "g2": 1.0 + 0.1 * jax.random.normal(ks[10], (vote_c,), jnp.float32),
        "be2": w(ks[11], (vote_c,)),
        "m2": w(ks[12], (vote_c,)),
        "v2": 1.0 + 0.1 * jnp.abs(jax.random.normal(ks[13], (vote_c,), jnp.float32)),
        # conv3
        "w3": w(ks[14], (3 + 1 + out_dim, vote_c)), "b3": w(ks[15], (3 + 1 + out_dim,)),
    }

    out = candidate_vote_v2(xyz, features_pm, params, out_dim=out_dim)
    jax.block_until_ready(out)

    assert out["vote_xyz"].shape == (B, N, 3)
    assert out["vote_xyz_offset"].shape == (B, N, 3)
    assert out["vote_scores"].shape == (B, N)
    assert out["vote_features"].shape == (B, N, out_dim)

    ref = _reference(xyz, features_pm, params, out_dim=out_dim)
    for k in ("vote_xyz", "vote_xyz_offset", "vote_scores", "vote_features"):
        assert bool(jnp.allclose(out[k].astype(jnp.float32), ref[k],
                                 atol=1e-2, rtol=1e-2)), k

    print("KERNEL_OK")
</pallas_src>

<mosaic_0001>
module attributes {stable_mosaic.version = 11 : i64} {
  func.func @_vote_head_kernel(%arg0: i32, %arg1: memref<128x128xf32, #tpu.memory_space<vmem>>, %arg2: memref<128x256xbf16, #tpu.memory_space<vmem>>, %arg3: memref<1x256xf32, #tpu.memory_space<vmem>>, %arg4: memref<256x256xbf16, #tpu.memory_space<vmem>>, %arg5: memref<1x256xf32, #tpu.memory_space<vmem>>, %arg6: memref<256x132xbf16, #tpu.memory_space<vmem>>, %arg7: memref<1x132xf32, #tpu.memory_space<vmem>>, %arg8: memref<128x4xbf16, #tpu.memory_space<vmem>>, %arg9: memref<128x128xbf16, #tpu.memory_space<vmem>>) attributes {dimension_semantics = [#tpu.dimension_semantics<parallel>], iteration_bounds = array<i64: 4>, scalar_prefetch = 0 : i64, scratch_operands = 0 : i64, tpu.core_type = #tpu.core_type<tc>, window_params = [{transform_indices = @transform_0, window_bounds = array<i64: 128, 128>}, {pipeline_mode = #tpu.pipeline_mode<synchronous>, transform_indices = @transform_1, window_bounds = array<i64: 128, 256>}, {pipeline_mode = #tpu.pipeline_mode<synchronous>, transform_indices = @transform_2, window_bounds = array<i64: 1, 256>}, {pipeline_mode = #tpu.pipeline_mode<synchronous>, transform_indices = @transform_3, window_bounds = array<i64: 256, 256>}, {pipeline_mode = #tpu.pipeline_mode<synchronous>, transform_indices = @transform_4, window_bounds = array<i64: 1, 256>}, {pipeline_mode = #tpu.pipeline_mode<synchronous>, transform_indices = @transform_5, window_bounds = array<i64: 256, 132>}, {pipeline_mode = #tpu.pipeline_mode<synchronous>, transform_indices = @transform_6, window_bounds = array<i64: 1, 132>}, {transform_indices = @transform_7, window_bounds = array<i64: 128, 4>}, {transform_indices = @transform_8, window_bounds = array<i64: 128, 128>}]} {
    %c0 = arith.constant 0 : index
    %c0_0 = arith.constant 0 : index
    %0 = vector.load %arg1[%c0, %c0_0] : memref<128x128xf32, #tpu.memory_space<vmem>>, vector<128x128xf32>
    %1 = arith.truncf %0 : vector<128x128xf32> to vector<128x128xbf16>
    %c0_1 = arith.constant 0 : index
    %c0_2 = arith.constant 0 : index
    %2 = vector.load %arg2[%c0_1, %c0_2] : memref<128x256xbf16, #tpu.memory_space<vmem>>, vector<128x256xbf16>
    %cst = arith.constant dense<0.000000e+00> : vector<128x256xf32>
    %3 = tpu.matmul %1, %2, %cst {dimension_numbers = #tpu.dot_dimension_numbers<[1], [0], [0], [1], [0, 0, 1, 1], [], []>} : vector<128x128xbf16>, vector<128x256xbf16>, vector<128x256xf32> -> vector<128x256xf32>
    %c0_3 = arith.constant 0 : index
    %c0_4 = arith.constant 0 : index
    %4 = vector.load %arg3[%c0_3, %c0_4] : memref<1x256xf32, #tpu.memory_space<vmem>>, vector<1x256xf32>
    %5 = vector.broadcast %4 : vector<1x256xf32> to vector<128x256xf32>
    %6 = arith.addf %3, %5 : vector<128x256xf32>
    %cst_5 = arith.constant 0.000000e+00 : f32
    %7 = vector.broadcast %cst_5 : f32 to vector<128x256xf32>
    %8 = arith.maximumf %6, %7 : vector<128x256xf32>
    %9 = arith.truncf %8 : vector<128x256xf32> to vector<128x256xbf16>
    %c0_6 = arith.constant 0 : index
    %c0_7 = arith.constant 0 : index
    %10 = vector.load %arg4[%c0_6, %c0_7] : memref<256x256xbf16, #tpu.memory_space<vmem>>, vector<256x256xbf16>
    %cst_8 = arith.constant dense<0.000000e+00> : vector<128x256xf32>
    %11 = tpu.matmul %9, %10, %cst_8 {dimension_numbers = #tpu.dot_dimension_numbers<[1], [0], [0], [1], [0, 0, 1, 1], [], []>} : vector<128x256xbf16>, vector<256x256xbf16>, vector<128x256xf32> -> vector<128x256xf32>
    %c0_9 = arith.constant 0 : index
    %c0_10 = arith.constant 0 : index
    %12 = vector.load %arg5[%c0_9, %c0_10] : memref<1x256xf32, #tpu.memory_space<vmem>>, vector<1x256xf32>
    %13 = vector.broadcast %12 : vector<1x256xf32> to vector<128x256xf32>
    %14 = arith.addf %11, %13 : vector<128x256xf32>
    %cst_11 = arith.constant 0.000000e+00 : f32
    %15 = vector.broadcast %cst_11 : f32 to vector<128x256xf32>
    %16 = arith.maximumf %14, %15 : vector<128x256xf32>
    %17 = arith.truncf %16 : vector<128x256xf32> to vector<128x256xbf16>
    %c0_12 = arith.constant 0 : index
    %c0_13 = arith.constant 0 : index
    %18 = vector.load %arg6[%c0_12, %c0_13] : memref<256x132xbf16, #tpu.memory_space<vmem>>, vector<256x132xbf16>
    %cst_14 = arith.constant dense<0.000000e+00> : vector<128x132xf32>
    %19 = tpu.matmul %17, %18, %cst_14 {dimension_numbers = #tpu.dot_dimension_numbers<[1], [0], [0], [1], [0, 0, 1, 1], [], []>} : vector<128x256xbf16>, vector<256x132xbf16>, vector<128x132xf32> -> vector<128x132xf32>
    %c0_15 = arith.constant 0 : index
    %c0_16 = arith.constant 0 : index
    %20 = vector.load %arg7[%c0_15, %c0_16] : memref<1x132xf32, #tpu.memory_space<vmem>>, vector<1x132xf32>
    %21 = vector.broadcast %20 : vector<1x132xf32> to vector<128x132xf32>
    %22 = arith.addf %19, %21 : vector<128x132xf32>
    %23 = vector.extract_strided_slice %22 {offsets = [0, 0], sizes = [128, 128], strides = [1, 1]} : vector<128x132xf32> to vector<128x128xf32>
    %24 = vector.extract_strided_slice %22 {offsets = [0, 128], sizes = [128, 4], strides = [1, 1]} : vector<128x132xf32> to vector<128x4xf32>
    %25 = tpu.iota {dimensions = array<i32: 1>} : vector<128x4xi32>
    %c3_i32 = arith.constant 3 : i32
    %26 = vector.broadcast %c3_i32 : i32 to vector<128x4xi32>
    %27 = arith.cmpi eq, %25, %26 : vector<128x4xi32>
    %28 = arith.negf %24 : vector<128x4xf32>
    %29 = math.exp %28 : vector<128x4xf32>
    %cst_17 = arith.constant 1.000000e+00 : f32
    %30 = vector.broadcast %cst_17 : f32 to vector<128x4xf32>
    %31 = arith.addf %30, %29 : vector<128x4xf32>
    %32 = arith.divf %30, %31 : vector<128x4xf32>
    %33 = arith.select %27, %32, %24 : vector<128x4xi1>, vector<128x4xf32>
    %34 = arith.truncf %33 : vector<128x4xf32> to vector<128x4xbf16>
    %c0_18 = arith.constant 0 : index
    %c0_19 = arith.constant 0 : index
    %35 = vector.load %arg8[%c0_18, %c0_19] : memref<128x4xbf16, #tpu.memory_space<vmem>>, vector<128x4xbf16>
    tpu.vector_store %arg8[%c0_18, %c0_19], %34 {strides = array<i32>} : memref<128x4xbf16, #tpu.memory_space<vmem>>, vector<128x4xbf16>,
    %c0_20 = arith.constant 0 : index
    %c0_21 = arith.constant 0 : index
    %36 = vector.load %arg1[%c0_20, %c0_21] : memref<128x128xf32, #tpu.memory_space<vmem>>, vector<128x128xf32>
    %37 = arith.addf %36, %23 : vector<128x128xf32>
    %38 = arith.mulf %37, %37 : vector<128x128xf32>
    %cst_22 = arith.constant dense<0.000000e+00> : vector<128xf32>
    %39 = vector.multi_reduction <add>, %38, %cst_22 [1] : vector<128x128xf32> to vector<128xf32>
    %40 = vector.shape_cast %39 : vector<128xf32> to vector<128x1xf32>
    %cst_23 = arith.constant 1.000000e-24 : f32
    %41 = vector.broadcast %cst_23 : f32 to vector<128x1xf32>
    %42 = arith.maximumf %40, %41 : vector<128x1xf32>
    %43 = math.rsqrt %42 : vector<128x1xf32>
    %44 = vector.broadcast %43 : vector<128x1xf32> to vector<128x128xf32>
    %45 = arith.mulf %37, %44 : vector<128x128xf32>
    %46 = arith.truncf %45 : vector<128x128xf32> to vector<128x128xbf16>
    %c0_24 = arith.constant 0 : index
    %c0_25 = arith.constant 0 : index
    %47 = vector.load %arg9[%c0_24, %c0_25] : memref<128x128xbf16, #tpu.memory_space<vmem>>, vector<128x128xbf16>
    tpu.vector_store %arg9[%c0_24, %c0_25], %46 {strides = array<i32>} : memref<128x128xbf16, #tpu.memory_space<vmem>>, vector<128x128xbf16>,
    return
  }
  func.func @transform_0(%arg0: i32) -> (i32, i32) {
    %c0_i32 = arith.constant 0 : i32
    %c0_i32_0 = arith.constant 0 : i32
    return %arg0, %c0_i32 : i32, i32
  }
  func.func @transform_1(%arg0: i32) -> (i32, i32) {
    %c0_i32 = arith.constant 0 : i32
    %c0_i32_0 = arith.constant 0 : i32
    %c0_i32_1 = arith.constant 0 : i32
    return %c0_i32, %c0_i32_0 : i32, i32
  }
  func.func @transform_2(%arg0: i32) -> (i32, i32) {
    %c0_i32 = arith.constant 0 : i32
    %c0_i32_0 = arith.constant 0 : i32
    %c0_i32_1 = arith.constant 0 : i32
    return %c0_i32, %c0_i32_0 : i32, i32
  }
  func.func @transform_3(%arg0: i32) -> (i32, i32) {
    %c0_i32 = arith.constant 0 : i32
    %c0_i32_0 = arith.constant 0 : i32
    %c0_i32_1 = arith.constant 0 : i32
    return %c0_i32, %c0_i32_0 : i32, i32
  }
  func.func @transform_4(%arg0: i32) -> (i32, i32) {
    %c0_i32 = arith.constant 0 : i32
    %c0_i32_0 = arith.constant 0 : i32
    %c0_i32_1 = arith.constant 0 : i32
    return %c0_i32, %c0_i32_0 : i32, i32
  }
  func.func @transform_5(%arg0: i32) -> (i32, i32) {
    %c0_i32 = arith.constant 0 : i32
    %c0_i32_0 = arith.constant 0 : i32
    %c0_i32_1 = arith.constant 0 : i32
    return %c0_i32, %c0_i32_0 : i32, i32
  }
  func.func @transform_6(%arg0: i32) -> (i32, i32) {
    %c0_i32 = arith.constant 0 : i32
    %c0_i32_0 = arith.constant 0 : i32
    %c0_i32_1 = arith.constant 0 : i32
    return %c0_i32, %c0_i32_0 : i32, i32
  }
  func.func @transform_7(%arg0: i32) -> (i32, i32) {
    %c0_i32 = arith.constant 0 : i32
    %c0_i32_0 = arith.constant 0 : i32
    return %arg0, %c0_i32 : i32, i32
  }
  func.func @transform_8(%arg0: i32) -> (i32, i32) {
    %c0_i32 = arith.constant 0 : i32
    %c0_i32_0 = arith.constant 0 : i32
    return %arg0, %c0_i32 : i32, i32
  }
}

</mosaic_0001>

<bundles_post_ra>
// kernel: tpu_custom_call.1
= control target key start
LH: loop header
LB: loop body
LE: loop exit
PB: predicated region body
PF: predicated region fallthrough
CT: control target
= control target key end

     0   :  { %14 = vsyncpa [#allocation3], 0  ;;  %s4120_s0 = inlined_call_operand.hbm [shape: f32[512,128], index: 0, kind: input, shape index: {}]   ;;  %s4121_s1 = inlined_call_operand.vmem [shape: bf16[128,256], index: 1, kind: input, shape index: {}]   ;;  %s4122_s2 = inlined_call_operand.vmem [shape: f32[1,256], index: 2, kind: input, shape index: {}]   ;;  %s4123_s3 = inlined_call_operand.vmem [shape: bf16[256,256], index: 3, kind: input, shape index: {}]   ;;  %s4124_s4 = inlined_call_operand.vmem [shape: f32[1,256], index: 4, kind: input, shape index: {}]   ;;  %s4125_s5 = inlined_call_operand.vmem [shape: bf16[256,132], index: 5, kind: input, shape index: {}]   ;;  %s4126_s6 = inlined_call_operand.vmem [shape: f32[1,132], index: 6, kind: input, shape index: {}]   ;;  %s4127_s7 = inlined_call_operand.vmem [shape: bf16[512,4], index: 7, kind: output, shape index: {0}]   ;;  %s4128_s8 = inlined_call_operand.hbm [shape: bf16[512,128], index: 8, kind: output, shape index: {1}]  }
   0x1   :  { %16 = vsyncpa [#allocation3 + $0x1], 0 }
   0x2   :  { %17 = vsyncpa [#allocation4], 0 }
   0x3   :  { %19 = vsyncpa [#allocation4 + $0x1], 0  ;;  %s3023_s27 = smov 0   ;;  %s3025_s28 = smov 0  }
   0x4   :  { %s3027_s29 = smov 0   ;;  %s3029_s30 = smov 0  }
   0x5 LB: > { %4130 = sst [smem:[#allocation8_spill]] %s2968_s29  ;;  %s3044_s9 = sadd.s32 4294967295, %s2972_s30   ;;  %s2972_s30 = sphi %s3029_s30, %s4142_s30   ;;  %s2968_s29 = sphi %s3027_s29, %s4139_s29   ;;  %s2964_s28 = sphi %s3025_s28, %s4141_s28   ;;  %s2960_s27 = sphi %s3023_s27, %s4140_s27  }
   0x6   : > { %s2233_s10 = sadd.s32 4294967294, %s2972_s30   ;;  %s3048_s11 = sadd.s32 1, %s2972_s30  }
   0x7   : > { %s32_s12 = sadd.s32 1, %s2968_s29  ;;  %s29_s13 = ssub.s32 %s2972_s30, %s3048_s11 }
   0x8   : > { %p39_p0 = scmp.ne.s32.totalorder %s2968_s29, %s2964_s28  ;;  %p30_p1 = scmp.eq.s32.totalorder %s29_s13, 0 }
   0x9   : > { %p40_p2 = scmp.eq.s32.totalorder %s2972_s30, 0  ;;  %p45_p3 = scmp.ne.s32.totalorder %s2964_s28, %s2960_s27 }
   0xa   : > { %p46_p4 = scmp.eq.s32.totalorder %s3044_s9, 0  ;;  %p221_p7 = scmp.eq.s32.totalorder %s3044_s9, 3 }
   0xb   : > { %s3060_s14 = scalar_select %p30_p1, %s2968_s29, %s32_s12  }
   0xc   : > { %p3062_p5 = por %p40_p2, %p39_p0  ;;  %p3066_p6 = por %p46_p4, %p45_p3 }
   0xd   : > { %4131 = sst [smem:[#allocation9_spill]] %s3060_s14  ;;  %p227_p8 = scmp.eq.s32.totalorder %s2233_s10, 3 }
   0xe   : > { %p2742_p9 = scmp.lt.s32.totalorder %s2972_s30, 4  ;;  %p3072_p10 = por %p221_p7, %p39_p0 }
   0xf   : > { %p3076_p11 = por %p227_p8, %p45_p3  ;;  %s265_s19 = sand.u32 1, %s2968_s29  }
  0x10   : > { %s2585_s20 = sshll.u32 %s2972_s30, 7  ;;  %s2236_s21 = sshll.u32 %s265_s19, 7 }
  0x11   : > { %s274_s24 = scalar_lea.hbm %s4120_s0, %s2585_s20  ;;  %s269_s26 = scalar_lea.vmem [#allocation2], %s2236_s21 }
  0x12   : > { %s275_s25 = sshll.u32 %s274_s24, 4  ;;  %s277_s12 = sshll.u32 %s269_s26, 4  ;;  %s276_s25 = int_to_ptr.hbm [resolvable:$true] %s275_s25  ;;  %s278_s12 = int_to_ptr.vmem [resolvable:$true] %s277_s12 }
  0x13   : > { %p3087_p12 = pnand %p2742_p9, %p3062_p5  ;;  %p2239_p13 = scmp.ge.s32.totalorder %s2972_s30, 1 }
  0x14   : > { %p285_p0 = scmp.lt.s32.totalorder %s2972_s30, 5  ;;  %s266_s13 = scalar_lea.sflag [#allocation3], %s265_s19 }
  0x15   : > { %s2876_s14 = sshra.s32 %s276_s25, 4  ;;  %p2880_p2 = pneg %p3087_p12  ;;  %s2877_s14 = int_to_ptr.hbm [resolvable:$true] %s2876_s14 }
  0x16   : > { %s2878_s29 = scalar_lea.hbm %s2877_s14, 128  ;;  %s2883_s15 = scalar_lea.hbm %s4120_s0, 512 }
  0x17   : > { %p2879_p1 = scmp.ne.s32.totalorder %s2877_s14, %s2878_s29  ;;  %p2884_p5 = scmp.lt.s32.totalorder %s2877_s14, %s4120_s0 }
  0x18   : > { %p2885_p7 = scmp.lt.s32.totalorder %s2883_s15, %s2878_s29 }
  0x19   : > { %p2881_p3 = pnand %p2880_p2, %p2879_p1 }
  0x1a   : > { %p2886_p8 = por %p2885_p7, %p2884_p5 }
  0x1b   : > { %p2882_p4 = pneg %p2881_p3 }
  0x1d   : > { %p2887_p9 = pnand %p2886_p8, %p2882_p4 }
  0x1f   : > { %2890 = shalt.err (!%p2887_p9)
}
  0x20   : > { %s2974_s19 = smov 128   ;;  %s2975_s24 = smov 8  }
  0x21   : > { %2737 = dma.hbm_to_vmem [thread:$0]  (!%p3087_p12), %s276_s25, 2048, %s278_s12, %s266_s13, %s2974_s19, %s2974_s19, %s2975_s24  }
  0x22   : > { %p286_p1 = pnand %p2239_p13, %p285_p0 }
  0x23   : > { %s3108_s26 = sand.u32 (!%p286_p1), 1, %s2964_s28  }
  0x24   : > { %289 = sbr.rel (%p286_p1) target bundleno = 768 (0x300), region = 48  ;;  %s2240_s29 = sshll.u32 (!%p286_p1), %s3108_s26, 7 }
  0x25   : > { %s292_s14 = scalar_lea.sflag (!%p286_p1), [#allocation3], %s3108_s26  ;;  %s3112_s20 = scalar_lea.vmem (!%p286_p1), [#allocation2], %s2240_s29 }
  0x29   : > { %2951 = dma.done.wait (%p3066_p6), %s292_s14, 2048  }
  0x2a   : > { %2953 = vsyncadd (%p3066_p6), %s292_s14, 4294965248  ;;  %v2302_v0 = vld [vmem:[%s4121_s1 + $0x70] sm:$0xf]  ;;  %v2601_v1 = vld [vmem:[%s4121_s1 + $0x74] sm:$0xf0]  ;;  %s2242_s12 = sshll.u32 %s3044_s9, 4 }
  0x2b   : > { %v2600_v2 = vld [vmem:[%s4121_s1 + $0x74] sm:$0xf]  ;;  %v2303_v3 = vor.u32 %v2601_v1, %v2302_v0  ;;  %v2304_v4 = vld [vmem:[%s4121_s1 + $0x78] sm:$0xf0]  ;;  %v2294_v5 = vld [vmem:[%s4121_s1 + $0x60] sm:$0xf] }
  0x2c   : > { %v2599_v6 = vld [vmem:[%s4121_s1 + $0x64] sm:$0xf0]  ;;  %v2307_v7 = vor.u32 %v2600_v2, %v2304_v4  ;;  %v2598_v8 = vld [vmem:[%s4121_s1 + $0x64] sm:$0xf]  ;;  %v2296_v9 = vld [vmem:[%s4121_s1 + $0x68] sm:$0xf0] }
  0x2d   : > { %468 = vmatpush.bf16.msra.mxu0 %v2303_v3  ;;  %v2295_v10 = vor.u32 %v2599_v6, %v2294_v5  ;;  %2714 = vmatpush.bf16.msra.mxu2 %v2303_v3  ;;  %v2299_v11 = vor.u32 %v2598_v8, %v2296_v9  ;;  %v2286_v12 = vld [vmem:[%s4121_s1 + $0x50] sm:$0xf]  ;;  %v2597_v13 = vld [vmem:[%s4121_s1 + $0x54] sm:$0xf0]  ;;  %v2596_v14 = vld [vmem:[%s4121_s1 + $0x54] sm:$0xf] }
  0x2e   : > { %517 = vmatpush.bf16.msra.mxu1 %v2307_v7  ;;  %2722 = vmatpush.bf16.msra.mxu3 %v2307_v7  ;;  %v2288_v15 = vld [vmem:[%s4121_s1 + $0x58] sm:$0xf0]  ;;  %v2287_v16 = vor.u32 %v2597_v13, %v2286_v12  ;;  %v2278_v18 = vld [vmem:[%s4121_s1 + $0x40] sm:$0xf]  ;;  %v2595_v19 = vld [vmem:[%s4121_s1 + $0x44] sm:$0xf0] }
  0x2f   : > { %v2291_v17 = vor.u32 %v2596_v14, %v2288_v15  ;;  %v2594_v20 = vld [vmem:[%s4121_s1 + $0x44] sm:$0xf]  ;;  %v2280_v21 = vld [vmem:[%s4121_s1 + $0x48] sm:$0xf0]  ;;  %v2279_v22 = vor.u32 %v2595_v19, %v2278_v18  ;;  %v2270_v24 = vld [vmem:[%s4121_s1 + $0x30] sm:$0xf] }
  0x30   : > { %v2283_v23 = vor.u32 %v2594_v20, %v2280_v21  ;;  %v2593_v25 = vld [vmem:[%s4121_s1 + $0x34] sm:$0xf0]  ;;  %v2592_v26 = vld [vmem:[%s4121_s1 + $0x34] sm:$0xf]  ;;  %v2272_v27 = vld [vmem:[%s4121_s1 + $0x38] sm:$0xf0] }
  0x31   : > { %469 = vmatpush.bf16.msra.mxu0 %v2295_v10  ;;  %2715 = vmatpush.bf16.msra.mxu2 %v2295_v10  ;;  %v2271_v28 = vor.u32 %v2593_v25, %v2270_v24  ;;  %v2275_v29 = vor.u32 %v2592_v26, %v2272_v27  ;;  %v2262_v30 = vld [vmem:[%s4121_s1 + $0x20] sm:$0xf]  ;;  %v2591_v31 = vld [vmem:[%s4121_s1 + $0x24] sm:$0xf0]  ;;  %v2590_v32 = vld [vmem:[%s4121_s1 + $0x24] sm:$0xf] }
  0x32   : > { %518 = vmatpush.bf16.msra.mxu1 %v2299_v11  ;;  %2723 = vmatpush.bf16.msra.mxu3 %v2299_v11  ;;  %v2264_v33 = vld [vmem:[%s4121_s1 + $0x28] sm:$0xf0]  ;;  %v2263_v34 = vor.u32 %v2591_v31, %v2262_v30  ;;  %v2254_v36 = vld [vmem:[%s4121_s1 + $0x10] sm:$0xf]  ;;  %v2589_v37 = vld [vmem:[%s4121_s1 + $0x14] sm:$0xf0] }
  0x33   : > { %v2267_v35 = vor.u32 %v2590_v32, %v2264_v33  ;;  %v2588_v38 = vld [vmem:[%s4121_s1 + $0x14] sm:$0xf]  ;;  %v2256_v39 = vld [vmem:[%s4121_s1 + $0x18] sm:$0xf0]  ;;  %v2255_v40 = vor.u32 %v2589_v37, %v2254_v36  ;;  %v2246_v42 = vld [vmem:[%s4121_s1] sm:$0xf] }
  0x34   : > { %v2259_v41 = vor.u32 %v2588_v38, %v2256_v39  ;;  %v2587_v43 = vld [vmem:[%s4121_s1 + $0x4] sm:$0xf0]  ;;  %v2586_v44 = vld [vmem:[%s4121_s1 + $0x4] sm:$0xf]  ;;  %v2248_v45 = vld [vmem:[%s4121_s1 + $0x8] sm:$0xf0] }
  0x35   : > { %470 = vmatpush.bf16.msra.mxu0 %v2287_v16  ;;  %2716 = vmatpush.bf16.msra.mxu2 %v2287_v16  ;;  %v2247_v46 = vor.u32 %v2587_v43, %v2246_v42  ;;  %v342_v47 = vld [vmem:[%s3112_s20] sm:$0xff]  ;;  %v343_v48 = vld [vmem:[%s3112_s20 + $0x8] sm:$0xff]  ;;  %v2251_v49 = vor.u32 %v2586_v44, %v2248_v45  ;;  %v344_v51 = vld [vmem:[%s3112_s20 + $0x10] sm:$0xff]  ;;  %p3724_p6 = scmp.lt.s32.totalorder %s2242_s12, 63  ;;  %vm1789_vm5 = vcmask 27648   ;;  %s2666_s19 = sshll.u32 %s3044_s9, 6 }
  0x36   : > { %519 = vmatpush.bf16.msra.mxu1 %v2291_v17  ;;  %2724 = vmatpush.bf16.msra.mxu3 %v2291_v17  ;;  %v358_v50 = vpack.c.bf16 %v343_v48, %v342_v47  ;;  %v345_v52 = vld [vmem:[%s3112_s20 + $0x18] sm:$0xff]  ;;  %v350_v54 = vld [vmem:[%s3112_s20 + $0x40] sm:$0xff]  ;;  %v351_v55 = vld [vmem:[%s3112_s20 + $0x48] sm:$0xff]  ;;  %s2131_s29 = scalar_lea.hbm %s4128_s8, %s2666_s19  ;;  %s2116_s25 = scalar_lea.sflag [#allocation4], %s3108_s26 }
  0x37   : > { %v359_v53 = vpack.c.bf16 %v345_v52, %v344_v51  ;;  %v362_v56 = vpack.c.bf16 %v351_v55, %v350_v54  ;;  %v2366_v57 = vld [vmem:[%s4123_s3 + $0x70] sm:$0xf]  ;;  %v2617_v58 = vld [vmem:[%s4123_s3 + $0x74] sm:$0xf0]  ;;  %v2358_v63 = vld [vmem:[%s4123_s3 + $0x60] sm:$0xf] }
  0x38   : > { %v2430_v59 = vld [vmem:[%s4123_s3 + $0xf0] sm:$0xf]  ;;  %v2633_v60 = vld [vmem:[%s4123_s3 + $0xf4] sm:$0xf0]  ;;  %v2367_v61 = vor.u32 %v2617_v58, %v2366_v57  ;;  %v2615_v0 = vld [vmem:[%s4123_s3 + $0x64] sm:$0xf0] }
  0x39   : > { %471 = vmatpush.bf16.msra.mxu0 %v2279_v22  ;;  %2717 = vmatpush.bf16.msra.mxu2 %v2279_v22  ;;  %v2431_v62 = vor.u32 %v2633_v60, %v2430_v59  ;;  %v2616_v1 = vld [vmem:[%s4123_s3 + $0x74] sm:$0xf]  ;;  %v2368_v2 = vld [vmem:[%s4123_s3 + $0x78] sm:$0xf0]  ;;  %v2359_v3 = vor.u32 %v2615_v0, %v2358_v63  ;;  %v2422_v5 = vld [vmem:[%s4123_s3 + $0xe0] sm:$0xf] }
  0x3a   : > { %520 = vmatpush.bf16.msra.mxu1 %v2283_v23  ;;  %2725 = vmatpush.bf16.msra.mxu3 %v2283_v23  ;;  %v2371_v4 = vor.u32 %v2616_v1, %v2368_v2  ;;  %v2631_v6 = vld [vmem:[%s4123_s3 + $0xe4] sm:$0xf0]  ;;  %v2632_v7 = vld [vmem:[%s4123_s3 + $0xf4] sm:$0xf]  ;;  %v2432_v9 = vld [vmem:[%s4123_s3 + $0xf8] sm:$0xf0] }
  0x3b   : > { %v2423_v8 = vor.u32 %v2631_v6, %v2422_v5  ;;  %v2350_v10 = vld [vmem:[%s4123_s3 + $0x50] sm:$0xf]  ;;  %v2613_v11 = vld [vmem:[%s4123_s3 + $0x54] sm:$0xf0]  ;;  %v2435_v12 = vor.u32 %v2632_v7, %v2432_v9  ;;  %v2614_v13 = vld [vmem:[%s4123_s3 + $0x64] sm:$0xf] }
  0x3c   : > { %v2360_v14 = vld [vmem:[%s4123_s3 + $0x68] sm:$0xf0]  ;;  %v2414_v15 = vld [vmem:[%s4123_s3 + $0xd0] sm:$0xf]  ;;  %v2629_v17 = vld [vmem:[%s4123_s3 + $0xd4] sm:$0xf0]  ;;  %v2351_v22 = vor.u32 %v2613_v11, %v2350_v10 }
  0x3d   : > { %472 = vmatpush.bf16.msra.mxu0 %v2271_v28  ;;  %2718 = vmatpush.bf16.msra.mxu2 %v2271_v28  ;;  %v2363_v16 = vor.u32 %v2614_v13, %v2360_v14  ;;  %v2630_v18 = vld [vmem:[%s4123_s3 + $0xe4] sm:$0xf]  ;;  %v2424_v19 = vld [vmem:[%s4123_s3 + $0xe8] sm:$0xf0]  ;;  %v2415_v23 = vor.u32 %v2629_v17, %v2414_v15  ;;  %v352_v26 = vld [vmem:[%s3112_s20 + $0x50] sm:$0xff]  ;;  %s4144_s12 = smov (!%p3724_p6, %s2242_s12), 63 }
  0x3e   : > { %521 = vmatpush.bf16.msra.mxu1 %v2275_v29  ;;  %2726 = vmatpush.bf16.msra.mxu3 %v2275_v29  ;;  %v346_v20 = vld [vmem:[%s3112_s20 + $0x20] sm:$0xff]  ;;  %v347_v21 = vld [vmem:[%s3112_s20 + $0x28] sm:$0xff]  ;;  %v2427_v24 = vor.u32 %v2630_v18, %v2424_v19  ;;  %v353_v27 = vld [vmem:[%s3112_s20 + $0x58] sm:$0xff]  ;;  %s2243_s13 = sshll.u32 %s4144_s12, 2  ;;  %s2134_s9 = sshll.u32 %s2131_s29, 4  ;;  %s2135_s9 = int_to_ptr.hbm [resolvable:$true] %s2134_s9 }
  0x3f   : > { %v360_v25 = vpack.c.bf16 %v347_v21, %v346_v20  ;;  %v363_v28 = vpack.c.bf16 %v353_v27, %v352_v26  ;;  %v2342_v29 = vld [vmem:[%s4123_s3 + $0x40] sm:$0xf]  ;;  %v2611_v30 = vld [vmem:[%s4123_s3 + $0x44] sm:$0xf0]  ;;  %v2612_v31 = vld [vmem:[%s4123_s3 + $0x54] sm:$0xf]  ;;  %s3756_s22 = scalar_lea.vmem %s4127_s7, %s2243_s13 }
  0x40   : > { %v2343_v32 = vor.u32 %v2611_v30, %v2342_v29  ;;  %v2352_v33 = vld [vmem:[%s4123_s3 + $0x58] sm:$0xf0]  ;;  %v2628_v38 = vld [vmem:[%s4123_s3 + $0xd4] sm:$0xf]  ;;  %v2609_v42 = vld [vmem:[%s4123_s3 + $0x34] sm:$0xf0] }
  0x41   : > { %473 = vmatpush.bf16.msra.mxu0 %v2263_v34  ;;  %2719 = vmatpush.bf16.msra.mxu2 %v2263_v34  ;;  %v2406_v34 = vld [vmem:[%s4123_s3 + $0xc0] sm:$0xf]  ;;  %v2355_v36 = vor.u32 %v2612_v31, %v2352_v33  ;;  %v2416_v39 = vld [vmem:[%s4123_s3 + $0xd8] sm:$0xf0]  ;;  %v2610_v43 = vld [vmem:[%s4123_s3 + $0x44] sm:$0xf] }
  0x42   : > { %522 = vmatpush.bf16.msra.mxu1 %v2267_v35  ;;  %2727 = vmatpush.bf16.msra.mxu3 %v2267_v35  ;;  %v2627_v35 = vld [vmem:[%s4123_s3 + $0xc4] sm:$0xf0]  ;;  %v2344_v44 = vld [vmem:[%s4123_s3 + $0x48] sm:$0xf0]  ;;  %v348_v45 = vld [vmem:[%s3112_s20 + $0x30] sm:$0xff]  ;;  %s2920_s12 = sshra.s32 %s2135_s9, 4  ;;  %s2921_s12 = int_to_ptr.hbm [resolvable:$true] %s2920_s12 }
  0x43   : > { %v2407_v37 = vor.u32 %v2627_v35, %v2406_v34  ;;  %v2347_v48 = vor.u32 %v2610_v43, %v2344_v44  ;;  %v2626_v51 = vld [vmem:[%s4123_s3 + $0xc4] sm:$0xf]  ;;  %v2326_v54 = vld [vmem:[%s4123_s3 + $0x20] sm:$0xf]  ;;  %v2607_v55 = vld [vmem:[%s4123_s3 + $0x24] sm:$0xf0]  ;;  %p2927_p2 = scmp.lt.s32.totalorder %s2921_s12, %s4128_s8 }
  0x44   : > { %v2608_v57 = vld [vmem:[%s4123_s3 + $0x34] sm:$0xf]  ;;  %v2336_v58 = vld [vmem:[%s4123_s3 + $0x38] sm:$0xf0]  ;;  %v2390_v59 = vld [vmem:[%s4123_s3 + $0xa0] sm:$0xf]  ;;  %v2327_v60 = vor.u32 %v2607_v55, %v2326_v54 }
  0x45   : > { %474 = vmatpush.bf16.msra.mxu0 %v2255_v40  ;;  %2720 = vmatpush.bf16.msra.mxu2 %v2255_v40  ;;  %v2334_v40 = vld [vmem:[%s4123_s3 + $0x30] sm:$0xf]  ;;  %v2400_v63 = vld [vmem:[%s4123_s3 + $0xb8] sm:$0xf0]  ;;  %v2339_v0 = vor.u32 %v2608_v57, %v2336_v58  ;;  %v354_v5 = vld [vmem:[%s3112_s20 + $0x60] sm:$0xff]  ;;  %s2922_s10 = scalar_lea.hbm %s2921_s12, 64 }
  0x46   : > { %523 = vmatpush.bf16.msra.mxu1 %v2259_v41  ;;  %2728 = vmatpush.bf16.msra.mxu3 %v2259_v41  ;;  %v2419_v41 = vor.u32 %v2628_v38, %v2416_v39  ;;  %v2335_v47 = vor.u32 %v2609_v42, %v2334_v40  ;;  %v2318_v2 = vld [vmem:[%s4123_s3 + $0x10] sm:$0xf]  ;;  %v355_v6 = vld [vmem:[%s3112_s20 + $0x68] sm:$0xff]  ;;  %v357_v14 = vld [vmem:[%s3112_s20 + $0x78] sm:$0xff]  ;;  %p2923_p12 = scmp.ne.s32.totalorder %s2921_s12, %s2922_s10  ;;  %s2926_s15 = scalar_lea.hbm %s4128_s8, 256 }
  0x47   : > { %v2328_v9 = vld [vmem:[%s4123_s3 + $0x28] sm:$0xf0]  ;;  %v364_v11 = vpack.c.bf16 %v355_v6, %v354_v5  ;;  %v356_v13 = vld [vmem:[%s3112_s20 + $0x70] sm:$0xff]  ;;  %v2621_v20 = vld [vmem:[%s4123_s3 + $0x94] sm:$0xf0]  ;;  %p2928_p3 = scmp.lt.s32.totalorder %s2926_s15, %s2922_s10 }
  0x48   : > { %v365_v15 = vpack.c.bf16 %v357_v14, %v356_v13  ;;  %v2392_v17 = vld [vmem:[%s4123_s3 + $0xa8] sm:$0xf0]  ;;  %v2382_v19 = vld [vmem:[%s4123_s3 + $0x90] sm:$0xf]  ;;  %v2310_v21 = vld [vmem:[%s4123_s3] sm:$0xf]  ;;  %p2924_p13 = pnand %p2923_p12, %p3072_p10 }
  0x49   : > { %475 = vmatpush.bf16.msra.mxu0 %v2247_v46  ;;  %2721 = vmatpush.bf16.msra.mxu2 %v2247_v46  ;;  %v349_v46 = vld [vmem:[%s3112_s20 + $0x38] sm:$0xff]  ;;  %v2374_v31 = vld [vmem:[%s4123_s3 + $0x80] sm:$0xf]  ;;  %v2602_v33 = vld [vmem:[%s4123_s3 + $0x4] sm:$0xf]  ;;  %p2929_p4 = por %p2928_p3, %p2927_p2 }
  0x4a   : > { %524 = vmatpush.bf16.msra.mxu1 %v2251_v49  ;;  %2729 = vmatpush.bf16.msra.mxu3 %v2251_v49  ;;  %v2398_v49 = vld [vmem:[%s4123_s3 + $0xb0] sm:$0xf]  ;;  %v2384_v29 = vld [vmem:[%s4123_s3 + $0x98] sm:$0xf0]  ;;  %v2312_v35 = vld [vmem:[%s4123_s3 + $0x8] sm:$0xf0]  ;;  %p2925_p0 = pneg %p2924_p13 }
  0x4b   : > { %v2315_v38 = vor.u32 %v2602_v33, %v2312_v35  ;;  %v382_v40 = vld [vmem:[%s4122_s2] sm:$0x3]  ;;  %v2663_v5 = vld [vmem:[%s4125_s5 + $0xe4] sm:$0xf0] }
  0x4c   : > { %476 = vmatmul.bf16.vlgmr.msra.gmra.mxu0 %v358_v50  ;;  %496 = vmatmul.bf16.vlgmr.msra.gmra.mxu2 %v362_v56  ;;  %v3425_v43 = vperm.slane %v382_v40, 0  ;;  %v3427_v44 = vperm.slane %v382_v40, 1  ;;  %p2930_p5 = pnand %p2929_p4, %p2925_p0 }
  0x4d   : > { %525 = vmatmul.bf16.vlgmr.msra.gmra.mxu1 %v358_v50  ;;  %545 = vmatmul.bf16.vlgmr.msra.gmra.mxu3 %v362_v56  ;;  %v2625_v50 = vld [vmem:[%s4123_s3 + $0xb4] sm:$0xf0] }
  0x4e   : > { %812 = vmatpush.bf16.msrb.mxu2 %v2367_v61  ;;  %861 = vmatpush.bf16.msrb.mxu3 %v2431_v62  ;;  %v2399_v52 = vor.u32 %v2625_v50, %v2398_v49  ;;  %v2623_v61 = vld [vmem:[%s4123_s3 + $0xa4] sm:$0xf0]  ;;  %v2624_v62 = vld [vmem:[%s4123_s3 + $0xb4] sm:$0xf]  ;;  %v2665_v49 = vld [vmem:[%s4125_s5 + $0xf4] sm:$0xf0] }
  0x4f   : > { %910 = vmatpush.bf16.msrb.mxu0 %v2371_v4  ;;  %959 = vmatpush.bf16.msrb.mxu1 %v2435_v12  ;;  %v2391_v1 = vor.u32 %v2623_v61, %v2390_v59  ;;  %v361_v4 = vpack.c.bf16 %v349_v46, %v348_v45  ;;  %v2403_v7 = vor.u32 %v2624_v62, %v2400_v63  ;;  %v2494_v45 = vld [vmem:[%s4125_s5 + $0x70] sm:$0xf]  ;;  %v2649_v46 = vld [vmem:[%s4125_s5 + $0x74] sm:$0xf0] }
  0x52   : > { %813 = vmatpush.bf16.msrb.mxu2 %v2359_v3  ;;  %862 = vmatpush.bf16.msrb.mxu3 %v2423_v8  ;;  %v2605_v3 = vld [vmem:[%s4123_s3 + $0x14] sm:$0xf0]  ;;  %v2606_v8 = vld [vmem:[%s4123_s3 + $0x24] sm:$0xf] }
  0x53   : > { %911 = vmatpush.bf16.msrb.mxu0 %v2363_v16  ;;  %960 = vmatpush.bf16.msrb.mxu1 %v2427_v24  ;;  %v2319_v10 = vor.u32 %v2605_v3, %v2318_v2  ;;  %v2331_v12 = vor.u32 %v2606_v8, %v2328_v9  ;;  %v2622_v16 = vld [vmem:[%s4123_s3 + $0xa4] sm:$0xf]  ;;  %v2604_v24 = vld [vmem:[%s4123_s3 + $0x14] sm:$0xf]  ;;  %v2647_v2 = vld [vmem:[%s4125_s5 + $0x64] sm:$0xf0] }
  0x54   : > { %v2395_v18 = vor.u32 %v2622_v16, %v2392_v17 }
  0x56   : > { %814 = vmatpush.bf16.msrb.mxu2 %v2351_v22  ;;  %863 = vmatpush.bf16.msrb.mxu3 %v2415_v23  ;;  %v2383_v22 = vor.u32 %v2621_v20, %v2382_v19  ;;  %v2603_v23 = vld [vmem:[%s4123_s3 + $0x4] sm:$0xf0]  ;;  %v2478_v20 = vld [vmem:[%s4125_s5 + $0x50] sm:$0xf] }
  0x57   : > { %912 = vmatpush.bf16.msrb.mxu0 %v2355_v36  ;;  %961 = vmatpush.bf16.msrb.mxu1 %v2419_v41  ;;  %v2311_v26 = vor.u32 %v2603_v23, %v2310_v21  ;;  %v2618_v36 = vld [vmem:[%s4123_s3 + $0x84] sm:$0xf]  ;;  %v2645_v21 = vld [vmem:[%s4125_s5 + $0x54] sm:$0xf0] }
  0x5a   : > { %815 = vmatpush.bf16.msrb.mxu2 %v2343_v32  ;;  %864 = vmatpush.bf16.msrb.mxu3 %v2407_v37  ;;  %v2619_v32 = vld [vmem:[%s4123_s3 + $0x84] sm:$0xf0]  ;;  %v2376_v37 = vld [vmem:[%s4123_s3 + $0x88] sm:$0xf0] }
  0x5b   : > { %913 = vmatpush.bf16.msrb.mxu0 %v2347_v48  ;;  %v2375_v34 = vor.u32 %v2619_v32, %v2374_v31  ;;  %v2379_v39 = vor.u32 %v2618_v36, %v2376_v37  ;;  %v2558_v48 = vld [vmem:[%s4125_s5 + $0xf0] sm:$0xf] }
  0x5c   : > { %481 = vmatmul.bf16.gmra.mxu0 %v359_v53  ;;  %501 = vmatmul.bf16.gmra.mxu2 %v363_v28  ;;  %v2559_v50 = vor.u32 %v2665_v49, %v2558_v48  ;;  %v2659_v49 = vld [vmem:[%s4125_s5 + $0xc4] sm:$0xf0] }
  0x5d   : > { %530 = vmatmul.bf16.gmra.mxu1 %v359_v53  ;;  %550 = vmatmul.bf16.gmra.mxu3 %v363_v28  ;;  %v2408_v53 = vld [vmem:[%s4123_s3 + $0xc8] sm:$0xf0]  ;;  %v2620_v28 = vld [vmem:[%s4123_s3 + $0x94] sm:$0xf] }
  0x5e   : > { %v2411_v56 = vor.u32 %v2626_v51, %v2408_v53  ;;  %816 = vmatpush.bf16.msrb.mxu2 %v2335_v47  ;;  %865 = vmatpush.bf16.msrb.mxu3 %v2399_v52  ;;  %v2387_v30 = vor.u32 %v2620_v28, %v2384_v29  ;;  %v2495_v47 = vor.u32 %v2649_v46, %v2494_v45  ;;  %v2643_v45 = vld [vmem:[%s4125_s5 + $0x44] sm:$0xf0]  ;;  %v2534_v46 = vld [vmem:[%s4125_s5 + $0xc0] sm:$0xf] }
  0x5f   : > { %914 = vmatpush.bf16.msrb.mxu0 %v2339_v0 }
  0x60   : > { %962 = vmatpush.bf16.msrb.mxu1 %v2411_v56 }
  0x62   : > { %817 = vmatpush.bf16.msrb.mxu2 %v2327_v60  ;;  %866 = vmatpush.bf16.msrb.mxu3 %v2391_v1  ;;  %v2486_v1 = vld [vmem:[%s4125_s5 + $0x60] sm:$0xf] }
  0x63   : > { %915 = vmatpush.bf16.msrb.mxu0 %v2331_v12  ;;  %v2487_v3 = vor.u32 %v2647_v2, %v2486_v1  ;;  %v2462_v2 = vld [vmem:[%s4125_s5 + $0x30] sm:$0xf] }
  0x64   : > { %963 = vmatpush.bf16.msrb.mxu1 %v2403_v7 }
  0x66   : > { %818 = vmatpush.bf16.msrb.mxu2 %v2319_v10  ;;  %867 = vmatpush.bf16.msrb.mxu3 %v2383_v22  ;;  %v2542_v22 = vld [vmem:[%s4125_s5 + $0xd0] sm:$0xf] }
  0x68   : > { %964 = vmatpush.bf16.msrb.mxu1 %v2395_v18 }
  0x6a   : > { %819 = vmatpush.bf16.msrb.mxu2 %v2311_v26  ;;  %868 = vmatpush.bf16.msrb.mxu3 %v2375_v34 }
  0x6c   : > { %486 = vmatmul.bf16.gmra.mxu0 %v360_v25  ;;  %506 = vmatmul.bf16.gmra.mxu2 %v364_v11 }
  0x6d   : > { %535 = vmatmul.bf16.gmra.mxu1 %v360_v25  ;;  %555 = vmatmul.bf16.gmra.mxu3 %v364_v11  ;;  %v2320_v25 = vld [vmem:[%s4123_s3 + $0x18] sm:$0xf0] }
  0x6e   : > { %v2323_v27 = vor.u32 %v2604_v24, %v2320_v25  ;;  %965 = vmatpush.bf16.msrb.mxu1 %v2387_v30  ;;  %1254 = vmatpush.bf16.msra.mxu2 %v2495_v47  ;;  %v2479_v24 = vor.u32 %v2645_v21, %v2478_v20  ;;  %v2661_v25 = vld [vmem:[%s4125_s5 + $0xd4] sm:$0xf0]  ;;  %v2454_v21 = vld [vmem:[%s4125_s5 + $0x20] sm:$0xf] }
  0x6f   : > { %1303 = vmatpush.bf16.msra.mxu3 %v2559_v50  ;;  %v2543_v26 = vor.u32 %v2661_v25, %v2542_v22  ;;  %v2535_v50 = vor.u32 %v2659_v49, %v2534_v46  ;;  %v2639_v22 = vld [vmem:[%s4125_s5 + $0x24] sm:$0xf0]  ;;  %v2662_v46 = vld [vmem:[%s4125_s5 + $0xe4] sm:$0xf] }
  0x70   : > { %916 = vmatpush.bf16.msrb.mxu0 %v2323_v27  ;;  %v2655_v25 = vld [vmem:[%s4125_s5 + $0xa4] sm:$0xf0] }
  0x72   : > { %966 = vmatpush.bf16.msrb.mxu1 %v2379_v39  ;;  %1255 = vmatpush.bf16.msra.mxu2 %v2487_v3  ;;  %v2641_v3 = vld [vmem:[%s4125_s5 + $0x34] sm:$0xf0] }
  0x74   : > { %917 = vmatpush.bf16.msrb.mxu0 %v2315_v38 }
  0x76   : > { %1256 = vmatpush.bf16.msra.mxu2 %v2479_v24  ;;  %v2455_v24 = vor.u32 %v2639_v22, %v2454_v21  ;;  %v2642_v21 = vld [vmem:[%s4125_s5 + $0x44] sm:$0xf]  ;;  %v2472_v22 = vld [vmem:[%s4125_s5 + $0x48] sm:$0xf0] }
  0x7c   : > { %491 = vmatmul.bf16.gmra.mxu0 %v361_v4  ;;  %511 = vmatmul.bf16.gmra.mxu2 %v365_v15 }
  0x7d   : > { %540 = vmatmul.bf16.gmra.mxu1 %v361_v4  ;;  %560 = vmatmul.bf16.gmra.mxu3 %v365_v15  ;;  %v2550_v4 = vld [vmem:[%s4125_s5 + $0xe0] sm:$0xf] }
  0x7e   : > { %v2551_v6 = vor.u32 %v2663_v5, %v2550_v4  ;;  %v2526_v4 = vld [vmem:[%s4125_s5 + $0xb0] sm:$0xf] }
  0x80   : > { %1304 = vmatpush.bf16.msra.mxu3 %v2551_v6  ;;  %v2463_v6 = vor.u32 %v2641_v3, %v2462_v2 }
  0x84   : > { %1305 = vmatpush.bf16.msra.mxu3 %v2543_v26  ;;  %v2664_v26 = vld [vmem:[%s4125_s5 + $0xf4] sm:$0xf] }
  0x88   : > { %1306 = vmatpush.bf16.msra.mxu3 %v2535_v50  ;;  %v2637_v50 = vld [vmem:[%s4125_s5 + $0x14] sm:$0xf0] }
  0xc9   : > { %v477_v41 = vpop.f32.mrf.mxu0 }
  0xca   : > { %v526_v42 = vpop.f32.mrf.mxu1  ;;  %v478_v51 = vadd.f32 %v477_v41, %v3425_v43 }
  0xcb   : > { %v527_v52 = vadd.f32 %v526_v42, %v3427_v44  ;;  %v2470_v42 = vld [vmem:[%s4125_s5 + $0x40] sm:$0xf] }
  0xcc   : > { %v566_v57 = vmax.f32 %v478_v51, 0.0  ;;  %v2471_v48 = vor.u32 %v2643_v45, %v2470_v42 }
  0xcd   : > { %v567_v59 = vmax.f32 %v527_v52, 0.0 }
  0xce   : > { %1257 = vmatpush.bf16.msra.mxu2 %v2471_v48  ;;  %v2446_v48 = vld [vmem:[%s4125_s5 + $0x10] sm:$0xf] }
  0xcf   : > { %v497_v37 = vpop.f32.mrf.mxu2 }
  0xd0   : > { %v546_v39 = vpop.f32.mrf.mxu3 }
  0xd1   : > { %v479_v53 = vpop.f32.mrf.mxu0 }
  0xd2   : > { %v480_v54 = vadd.f32 %v479_v53, %v3425_v43  ;;  %v528_v55 = vpop.f32.mrf.mxu1  ;;  %1258 = vmatpush.bf16.msra.mxu2 %v2463_v6 }
  0xd3   : > { %v529_v56 = vadd.f32 %v528_v55, %v3427_v44 }
  0xd4   : > { %v568_v58 = vmax.f32 %v480_v54, 0.0 }
  0xd5   : > { %v569_v60 = vmax.f32 %v529_v56, 0.0 }
  0xd6   : > { %v598_v61 = vpack.c.bf16 %v568_v58, %v566_v57  ;;  %1259 = vmatpush.bf16.msra.mxu2 %v2455_v24  ;;  %v2654_v24 = vld [vmem:[%s4125_s5 + $0xa4] sm:$0xf] }
  0xd7   : > { %v599_v62 = vpack.c.bf16 %v569_v60, %v567_v59  ;;  %v499_v51 = vpop.f32.mrf.mxu2 }
  0xd8   : > { %820 = vmatmul.bf16.vlgmr.msrb.gmra.mxu2 %v598_v61  ;;  %918 = vmatmul.bf16.vlgmr.msrb.gmra.mxu0 %v598_v61  ;;  %v548_v53 = vpop.f32.mrf.mxu3 }
  0xd9   : > { %869 = vmatmul.bf16.vlgmr.msrb.gmra.mxu3 %v599_v62  ;;  %967 = vmatmul.bf16.vlgmr.msrb.gmra.mxu1 %v599_v62  ;;  %v482_v63 = vpop.f32.mrf.mxu0 }
  0xda   : > { %v531_v0 = vpop.f32.mrf.mxu1  ;;  %v483_v7 = vadd.f32 %v482_v63, %v3425_v43 }
  0xdb   : > { %v532_v8 = vadd.f32 %v531_v0, %v3427_v44 }
  0xdc   : > { %v570_v13 = vmax.f32 %v483_v7, 0.0  ;;  %v2657_v7 = vld [vmem:[%s4125_s5 + $0xb4] sm:$0xf0] }
  0xdd   : > { %v571_v15 = vmax.f32 %v532_v8, 0.0  ;;  %v2527_v8 = vor.u32 %v2657_v7, %v2526_v4 }
  0xdf   : > { %v502_v1 = vpop.f32.mrf.mxu2  ;;  %1307 = vmatpush.bf16.msra.mxu3 %v2527_v8 }
  0xe0   : > { %v551_v5 = vpop.f32.mrf.mxu3 }
  0xe1   : > { %v484_v9 = vpop.f32.mrf.mxu0 }
  0xe2   : > { %v485_v10 = vadd.f32 %v484_v9, %v3425_v43  ;;  %v533_v11 = vpop.f32.mrf.mxu1  ;;  %v498_v9 = vadd.f32 %v497_v37, %v3425_v43 }
  0xe3   : > { %v534_v12 = vadd.f32 %v533_v11, %v3427_v44  ;;  %v547_v11 = vadd.f32 %v546_v39, %v3427_v44 }
  0xe4   : > { %v572_v14 = vmax.f32 %v485_v10, 0.0  ;;  %v500_v10 = vadd.f32 %v499_v51, %v3425_v43  ;;  %v2648_v51 = vld [vmem:[%s4125_s5 + $0x74] sm:$0xf] }
  0xe5   : > { %v573_v16 = vmax.f32 %v534_v12, 0.0  ;;  %v549_v12 = vadd.f32 %v548_v53, %v3427_v44  ;;  %v2447_v53 = vor.u32 %v2637_v50, %v2446_v48 }
  0xe6   : > { %v600_v17 = vpack.c.bf16 %v572_v14, %v570_v13  ;;  %v582_v13 = vmax.f32 %v498_v9, 0.0  ;;  %v584_v14 = vmax.f32 %v500_v10, 0.0 }
  0xe7   : > { %v601_v18 = vpack.c.bf16 %v573_v16, %v571_v15  ;;  %v583_v15 = vmax.f32 %v547_v11, 0.0  ;;  %v585_v16 = vmax.f32 %v549_v12, 0.0  ;;  %1260 = vmatpush.bf16.msra.mxu2 %v2447_v53 }
  0xe8   : > { %825 = vmatmul.bf16.gmra.mxu2 %v600_v17  ;;  %923 = vmatmul.bf16.gmra.mxu0 %v600_v17  ;;  %v504_v17 = vpop.f32.mrf.mxu2 }
  0xe9   : > { %874 = vmatmul.bf16.gmra.mxu3 %v601_v18  ;;  %972 = vmatmul.bf16.gmra.mxu1 %v601_v18  ;;  %v487_v19 = vpop.f32.mrf.mxu0  ;;  %v553_v18 = vpop.f32.mrf.mxu3  ;;  %v607_v20 = vpack.c.bf16 %v585_v16, %v583_v15  ;;  %v2656_v16 = vld [vmem:[%s4125_s5 + $0xb4] sm:$0xf] }
  0xea   : > { %v536_v23 = vpop.f32.mrf.mxu1  ;;  %v488_v27 = vadd.f32 %v487_v19, %v3425_v43  ;;  %v606_v19 = vpack.c.bf16 %v584_v14, %v582_v13  ;;  %v2644_v13 = vld [vmem:[%s4125_s5 + $0x54] sm:$0xf]  ;;  %v2480_v14 = vld [vmem:[%s4125_s5 + $0x58] sm:$0xf0] }
  0xeb   : > { %v537_v28 = vadd.f32 %v536_v23, %v3427_v44  ;;  %v2518_v23 = vld [vmem:[%s4125_s5 + $0xa0] sm:$0xf]  ;;  %v2483_v15 = vor.u32 %v2644_v13, %v2480_v14 }
  0xec   : > { %v574_v33 = vmax.f32 %v488_v27, 0.0  ;;  %v2560_v27 = vld [vmem:[%s4125_s5 + $0xf8] sm:$0xf0] }
  0xed   : > { %v575_v35 = vmax.f32 %v537_v28, 0.0  ;;  %v2519_v28 = vor.u32 %v2655_v25, %v2518_v23  ;;  %v2475_v23 = vor.u32 %v2642_v21, %v2472_v22  ;;  %v2520_v25 = vld [vmem:[%s4125_s5 + $0xa8] sm:$0xf0] }
  0xef   : > { %1308 = vmatpush.bf16.msra.mxu3 %v2519_v28  ;;  %v2640_v28 = vld [vmem:[%s4125_s5 + $0x34] sm:$0xf] }
  0xf1   : > { %v489_v29 = vpop.f32.mrf.mxu0 }
  0xf2   : > { %v490_v30 = vadd.f32 %v489_v29, %v3425_v43  ;;  %v538_v31 = vpop.f32.mrf.mxu1  ;;  %v2563_v29 = vor.u32 %v2664_v26, %v2560_v27  ;;  %v2523_v26 = vor.u32 %v2654_v24, %v2520_v25 }
  0xf3   : > { %v539_v32 = vadd.f32 %v538_v31, %v3427_v44  ;;  %v503_v31 = vadd.f32 %v502_v1, %v3425_v43  ;;  %v2536_v1 = vld [vmem:[%s4125_s5 + $0xc8] sm:$0xf0] }
  0xf4   : > { %v576_v34 = vmax.f32 %v490_v30, 0.0  ;;  %v507_v30 = vpop.f32.mrf.mxu2  ;;  %1401 = vmatpush.bf16.msra.mxu1 %v2563_v29  ;;  %v2464_v29 = vld [vmem:[%s4125_s5 + $0x38] sm:$0xf0] }
  0xf5   : > { %v577_v36 = vmax.f32 %v539_v32, 0.0  ;;  %v505_v32 = vadd.f32 %v504_v17, %v3425_v43  ;;  %v508_v2 = vadd.f32 %v507_v30, %v3425_v43  ;;  %v2528_v17 = vld [vmem:[%s4125_s5 + $0xb8] sm:$0xf0] }
  0xf6   : > { %v602_v38 = vpack.c.bf16 %v576_v34, %v574_v33  ;;  %v556_v33 = vpop.f32.mrf.mxu3  ;;  %v552_v34 = vadd.f32 %v551_v5, %v3427_v44 }
  0xf7   : > { %v603_v40 = vpack.c.bf16 %v577_v36, %v575_v35  ;;  %v554_v35 = vadd.f32 %v553_v18, %v3427_v44  ;;  %v586_v36 = vmax.f32 %v503_v31, 0.0  ;;  %v588_v37 = vmax.f32 %v505_v32, 0.0  ;;  %v2652_v32 = vld [vmem:[%s4125_s5 + $0x94] sm:$0xf] }
  0xf8   : > { %830 = vmatmul.bf16.gmra.mxu2 %v602_v38  ;;  %928 = vmatmul.bf16.gmra.mxu0 %v602_v38  ;;  %v587_v38 = vmax.f32 %v552_v34, 0.0  ;;  %v557_v4 = vadd.f32 %v556_v33, %v3427_v44  ;;  %v590_v8 = vmax.f32 %v508_v2, 0.0  ;;  %v2467_v31 = vor.u32 %v2640_v28, %v2464_v29  ;;  %v2512_v33 = vld [vmem:[%s4125_s5 + $0x98] sm:$0xf0] }
  0xf9   : > { %879 = vmatmul.bf16.gmra.mxu3 %v603_v40  ;;  %977 = vmatmul.bf16.gmra.mxu1 %v603_v40  ;;  %v492_v41 = vpop.f32.mrf.mxu0  ;;  %v589_v39 = vmax.f32 %v554_v35, 0.0  ;;  %v608_v40 = vpack.c.bf16 %v588_v37, %v586_v36  ;;  %v2515_v36 = vor.u32 %v2652_v32, %v2512_v33 }
  0xfa   : > { %v541_v47 = vpop.f32.mrf.mxu1  ;;  %v493_v52 = vadd.f32 %v492_v41, %v3425_v43  ;;  %v591_v11 = vmax.f32 %v557_v4, 0.0 }
  0xfb   : > { %v542_v54 = vadd.f32 %v541_v47, %v3427_v44  ;;  %v609_v41 = vpack.c.bf16 %v589_v39, %v587_v38  ;;  %v2552_v47 = vld [vmem:[%s4125_s5 + $0xe8] sm:$0xf0]  ;;  %v2638_v39 = vld [vmem:[%s4125_s5 + $0x24] sm:$0xf] }
  0xfc   : > { %v578_v59 = vmax.f32 %v493_v52, 0.0  ;;  %v509_v42 = vpop.f32.mrf.mxu2  ;;  %v2555_v49 = vor.u32 %v2662_v46, %v2552_v47  ;;  %v2496_v52 = vld [vmem:[%s4125_s5 + $0x78] sm:$0xf0]  ;;  %v2651_v46 = vld [vmem:[%s4125_s5 + $0x84] sm:$0xf0] }
  0xfd   : > { %v579_v61 = vmax.f32 %v542_v54, 0.0  ;;  %v2499_v54 = vor.u32 %v2648_v51, %v2496_v52  ;;  %v510_v3 = vadd.f32 %v509_v42, %v3425_v43  ;;  %v2650_v47 = vld [vmem:[%s4125_s5 + $0x84] sm:$0xf]  ;;  %v2504_v51 = vld [vmem:[%s4125_s5 + $0x88] sm:$0xf0] }
  0xfe   : > { %v558_v45 = vpop.f32.mrf.mxu3  ;;  %1402 = vmatpush.bf16.msra.mxu1 %v2555_v49 }
  0xff   : > { %1352 = vmatpush.bf16.msra.mxu0 %v2499_v54  ;;  %v559_v5 = vadd.f32 %v558_v45, %v3427_v44  ;;  %v592_v9 = vmax.f32 %v510_v3, 0.0  ;;  %v2507_v54 = vor.u32 %v2650_v47, %v2504_v51 }
 0x101   : > { %v494_v55 = vpop.f32.mrf.mxu0  ;;  %v593_v12 = vmax.f32 %v559_v5, 0.0  ;;  %v610_v18 = vpack.c.bf16 %v592_v9, %v590_v8 }
 0x102   : > { %v495_v56 = vadd.f32 %v494_v55, %v3425_v43  ;;  %v543_v57 = vpop.f32.mrf.mxu1  ;;  %v2510_v55 = vld [vmem:[%s4125_s5 + $0x90] sm:$0xf] }
 0x103   : > { %v544_v58 = vadd.f32 %v543_v57, %v3427_v44  ;;  %v2660_v57 = vld [vmem:[%s4125_s5 + $0xd4] sm:$0xf] }
 0x104   : > { %v580_v60 = vmax.f32 %v495_v56, 0.0  ;;  %v2653_v56 = vld [vmem:[%s4125_s5 + $0x94] sm:$0xf0]  ;;  %v512_v7 = vpop.f32.mrf.mxu2 }
 0x105   : > { %v581_v62 = vmax.f32 %v544_v58, 0.0  ;;  %v2511_v58 = vor.u32 %v2653_v56, %v2510_v55  ;;  %v513_v34 = vadd.f32 %v512_v7, %v3425_v43  ;;  %v2636_v55 = vld [vmem:[%s4125_s5 + $0x14] sm:$0xf]  ;;  %v2448_v56 = vld [vmem:[%s4125_s5 + $0x18] sm:$0xf0] }
 0x106   : > { %v604_v63 = vpack.c.bf16 %v580_v60, %v578_v59  ;;  %v2544_v59 = vld [vmem:[%s4125_s5 + $0xd8] sm:$0xf0]  ;;  %v2646_v60 = vld [vmem:[%s4125_s5 + $0x64] sm:$0xf]  ;;  %v561_v10 = vpop.f32.mrf.mxu3 }
 0x107   : > { %v605_v0 = vpack.c.bf16 %v581_v62, %v579_v61  ;;  %v2488_v61 = vld [vmem:[%s4125_s5 + $0x68] sm:$0xf0]  ;;  %v2547_v62 = vor.u32 %v2660_v57, %v2544_v59  ;;  %1309 = vmatpush.bf16.msra.mxu3 %v2511_v58  ;;  %v562_v37 = vadd.f32 %v561_v10, %v3427_v44  ;;  %v594_v48 = vmax.f32 %v513_v34, 0.0 }
 0x108   : > { %835 = vmatmul.bf16.gmra.mxu2 %v604_v63  ;;  %933 = vmatmul.bf16.gmra.mxu0 %v604_v63  ;;  %v2491_v63 = vor.u32 %v2646_v60, %v2488_v61  ;;  %v2451_v57 = vor.u32 %v2636_v55, %v2448_v56  ;;  %v2634_v60 = vld [vmem:[%s4125_s5 + $0x4] sm:$0xf]  ;;  %v2440_v61 = vld [vmem:[%s4125_s5 + $0x8] sm:$0xf0] }
 0x109   : > { %884 = vmatmul.bf16.gmra.mxu3 %v605_v0  ;;  %982 = vmatmul.bf16.gmra.mxu1 %v605_v0  ;;  %v2658_v0 = vld [vmem:[%s4125_s5 + $0xc4] sm:$0xf]  ;;  %v595_v52 = vmax.f32 %v562_v37, 0.0 }
 0x10a   : > { %1403 = vmatpush.bf16.msra.mxu1 %v2547_v62  ;;  %v2539_v6 = vor.u32 %v2658_v0, %v2536_v1  ;;  %1353 = vmatpush.bf16.msra.mxu0 %v2491_v63  ;;  %v2443_v62 = vor.u32 %v2634_v60, %v2440_v61  ;;  %v646_v63 = vld [vmem:[%s4124_s4] sm:$0x3] }
 0x10b   : > { %v3656_v1 = vperm.slane %v646_v63, 1  ;;  %v3659_v5 = vperm.slane %v646_v63, 0 }
 0x10c   : > { %v514_v27 = vpop.f32.mrf.mxu2 }
 0x10d   : > { %v515_v35 = vadd.f32 %v514_v27, %v3425_v43  ;;  %v2635_v43 = vld [vmem:[%s4125_s5 + $0x4] sm:$0xf0] }
 0x10e   : > { %1404 = vmatpush.bf16.msra.mxu1 %v2539_v6  ;;  %1354 = vmatpush.bf16.msra.mxu0 %v2483_v15  ;;  %v563_v30 = vpop.f32.mrf.mxu3 }
 0x10f   : > { %v564_v38 = vadd.f32 %v563_v30, %v3427_v44  ;;  %v2502_v44 = vld [vmem:[%s4125_s5 + $0x80] sm:$0xf]  ;;  %v596_v49 = vmax.f32 %v515_v35, 0.0 }
 0x110   : > { %v2503_v50 = vor.u32 %v2651_v46, %v2502_v44 }
 0x111   : > { %v597_v53 = vmax.f32 %v564_v38, 0.0  ;;  %v612_v58 = vpack.c.bf16 %v596_v49, %v594_v48 }
 0x112   : > { %1355 = vmatpush.bf16.msra.mxu0 %v2475_v23  ;;  %1310 = vmatpush.bf16.msra.mxu3 %v2503_v50 }
 0x113   : > { %v613_v59 = vpack.c.bf16 %v597_v53, %v595_v52 }
 0x116   : > { %1356 = vmatpush.bf16.msra.mxu0 %v2467_v31 }
 0x118   : > { %840 = vmatmul.bf16.gmra.mxu2 %v606_v19  ;;  %938 = vmatmul.bf16.gmra.mxu0 %v606_v19  ;;  %v2531_v19 = vor.u32 %v2656_v16, %v2528_v17 }
 0x119   : > { %889 = vmatmul.bf16.gmra.mxu3 %v607_v20  ;;  %987 = vmatmul.bf16.gmra.mxu1 %v607_v20  ;;  %v611_v20 = vpack.c.bf16 %v593_v12, %v591_v11 }
 0x11a   : > { %1405 = vmatpush.bf16.msra.mxu1 %v2531_v19 }
 0x11e   : > { %1406 = vmatpush.bf16.msra.mxu1 %v2523_v26 }
 0x122   : > { %1407 = vmatpush.bf16.msra.mxu1 %v2515_v36 }
 0x126   : > { %1408 = vmatpush.bf16.msra.mxu1 %v2507_v54 }
 0x128   : > { %845 = vmatmul.bf16.gmra.mxu2 %v608_v40  ;;  %943 = vmatmul.bf16.gmra.mxu0 %v608_v40  ;;  %v2456_v40 = vld [vmem:[%s4125_s5 + $0x28] sm:$0xf0] }
 0x129   : > { %894 = vmatmul.bf16.gmra.mxu3 %v609_v41  ;;  %992 = vmatmul.bf16.gmra.mxu1 %v609_v41  ;;  %v2438_v41 = vld [vmem:[%s4125_s5] sm:$0xf]  ;;  %v2459_v42 = vor.u32 %v2638_v39, %v2456_v40 }
 0x12a   : > { %v2439_v45 = vor.u32 %v2635_v43, %v2438_v41 }
 0x12b   : > { %1357 = vmatpush.bf16.msra.mxu0 %v2459_v42 }
 0x12c   : > { %1261 = vmatpush.bf16.msra.mxu2 %v2439_v45 }
 0x12f   : > { %1358 = vmatpush.bf16.msra.mxu0 %v2451_v57 }
 0x133   : > { %1359 = vmatpush.bf16.msra.mxu0 %v2443_v62 }
 0x138   : > { %850 = vmatmul.bf16.gmra.mxu2 %v610_v18  ;;  %948 = vmatmul.bf16.gmra.mxu0 %v610_v18 }
 0x139   : > { %899 = vmatmul.bf16.gmra.mxu3 %v611_v20  ;;  %997 = vmatmul.bf16.gmra.mxu1 %v611_v20 }
 0x148   : > { %855 = vmatmul.bf16.gmra.mxu2 %v612_v58  ;;  %953 = vmatmul.bf16.gmra.mxu0 %v612_v58 }
 0x149   : > { %904 = vmatmul.bf16.gmra.mxu3 %v613_v59  ;;  %1002 = vmatmul.bf16.gmra.mxu1 %v613_v59 }
 0x155   : > { %v919_v0 = vpop.f32.mrf.mxu0 }
 0x156   : > { %v968_v2 = vpop.f32.mrf.mxu1  ;;  %v920_v3 = vadd.f32 %v919_v0, %v3656_v1 }
 0x158   : > { %v969_v8 = vadd.f32 %v968_v2, %v920_v3 }
 0x15a   : > { %v1009_v13 = vmax.f32 %v969_v8, 0.0 }
 0x15b   : > { %v821_v4 = vpop.f32.mrf.mxu2 }
 0x15c   : > { %v870_v6 = vpop.f32.mrf.mxu3  ;;  %v822_v11 = vadd.f32 %v821_v4, %v3659_v5 }
 0x15d   : > { %v921_v7 = vpop.f32.mrf.mxu0 }
 0x15e   : > { %v922_v9 = vadd.f32 %v921_v7, %v3656_v1  ;;  %v970_v10 = vpop.f32.mrf.mxu1  ;;  %v871_v16 = vadd.f32 %v870_v6, %v822_v11 }
 0x160   : > { %v971_v12 = vadd.f32 %v970_v10, %v922_v9  ;;  %v1008_v23 = vmax.f32 %v871_v16, 0.0 }
 0x162   : > { %v1011_v14 = vmax.f32 %v971_v12, 0.0 }
 0x163   : > { %v823_v15 = vpop.f32.mrf.mxu2 }
 0x164   : > { %v1041_v17 = vpack.c.bf16 %v1011_v14, %v1009_v13  ;;  %v824_v18 = vadd.f32 %v823_v15, %v3659_v5  ;;  %v872_v19 = vpop.f32.mrf.mxu3 }
 0x165   : > { %v924_v20 = vpop.f32.mrf.mxu0 }
 0x166   : > { %v873_v21 = vadd.f32 %v872_v19, %v824_v18  ;;  %v973_v22 = vpop.f32.mrf.mxu1  ;;  %1311 = vmatmul.bf16.vlgmr.msra.gmra.mxu3 %v1041_v17  ;;  %1409 = vmatmul.bf16.vlgmr.msra.gmra.mxu1 %v1041_v17  ;;  %v925_v26 = vadd.f32 %v924_v20, %v3656_v1 }
 0x168   : > { %v1010_v24 = vmax.f32 %v873_v21, 0.0  ;;  %v974_v30 = vadd.f32 %v973_v22, %v925_v26 }
 0x16a   : > { %v1040_v25 = vpack.c.bf16 %v1010_v24, %v1008_v23  ;;  %v1013_v35 = vmax.f32 %v974_v30, 0.0 }
 0x16b   : > { %v826_v27 = vpop.f32.mrf.mxu2 }
 0x16c   : > { %v875_v28 = vpop.f32.mrf.mxu3  ;;  %1262 = vmatmul.bf16.vlgmr.msra.gmra.mxu2 %v1040_v25  ;;  %1360 = vmatmul.bf16.vlgmr.msra.gmra.mxu0 %v1040_v25  ;;  %v827_v33 = vadd.f32 %v826_v27, %v3659_v5 }
 0x16d   : > { %v926_v29 = vpop.f32.mrf.mxu0 }
 0x16e   : > { %v927_v31 = vadd.f32 %v926_v29, %v3656_v1  ;;  %v975_v32 = vpop.f32.mrf.mxu1  ;;  %v876_v38 = vadd.f32 %v875_v28, %v827_v33 }
 0x170   : > { %v976_v34 = vadd.f32 %v975_v32, %v927_v31  ;;  %v1012_v44 = vmax.f32 %v876_v38, 0.0 }
 0x172   : > { %v1015_v36 = vmax.f32 %v976_v34, 0.0 }
 0x173   : > { %v828_v37 = vpop.f32.mrf.mxu2 }
 0x174   : > { %v829_v39 = vadd.f32 %v828_v37, %v3659_v5  ;;  %v877_v40 = vpop.f32.mrf.mxu3  ;;  %v1043_v41 = vpack.c.bf16 %v1015_v36, %v1013_v35 }
 0x175   : > { %v929_v43 = vpop.f32.mrf.mxu0 }
 0x176   : > { %v878_v42 = vadd.f32 %v877_v40, %v829_v39  ;;  %v978_v45 = vpop.f32.mrf.mxu1  ;;  %1316 = vmatmul.bf16.gmra.mxu3 %v1043_v41  ;;  %1414 = vmatmul.bf16.gmra.mxu1 %v1043_v41  ;;  %v930_v47 = vadd.f32 %v929_v43, %v3656_v1 }
 0x178   : > { %v1014_v46 = vmax.f32 %v878_v42, 0.0  ;;  %v979_v52 = vadd.f32 %v978_v45, %v930_v47 }
 0x17a   : > { %v1042_v48 = vpack.c.bf16 %v1014_v46, %v1012_v44  ;;  %v1017_v57 = vmax.f32 %v979_v52, 0.0 }
 0x17b   : > { %v831_v49 = vpop.f32.mrf.mxu2 }
 0x17c   : > { %v880_v50 = vpop.f32.mrf.mxu3  ;;  %1267 = vmatmul.bf16.gmra.mxu2 %v1042_v48  ;;  %1365 = vmatmul.bf16.gmra.mxu0 %v1042_v48  ;;  %v832_v55 = vadd.f32 %v831_v49, %v3659_v5 }
 0x17d   : > { %v931_v51 = vpop.f32.mrf.mxu0 }
 0x17e   : > { %v932_v53 = vadd.f32 %v931_v51, %v3656_v1  ;;  %v980_v54 = vpop.f32.mrf.mxu1  ;;  %v881_v60 = vadd.f32 %v880_v50, %v832_v55 }
 0x180   : > { %v981_v56 = vadd.f32 %v980_v54, %v932_v53  ;;  %v1016_v4 = vmax.f32 %v881_v60, 0.0 }
 0x182   : > { %v1019_v58 = vmax.f32 %v981_v56, 0.0 }
 0x183   : > { %v833_v59 = vpop.f32.mrf.mxu2 }
 0x184   : > { %v834_v61 = vadd.f32 %v833_v59, %v3659_v5  ;;  %v882_v62 = vpop.f32.mrf.mxu3  ;;  %v1045_v63 = vpack.c.bf16 %v1019_v58, %v1017_v57 }
 0x185   : > { %v934_v0 = vpop.f32.mrf.mxu0 }
 0x186   : > { %v883_v2 = vadd.f32 %v882_v62, %v834_v61  ;;  %v983_v3 = vpop.f32.mrf.mxu1  ;;  %1321 = vmatmul.bf16.gmra.mxu3 %v1045_v63  ;;  %1419 = vmatmul.bf16.gmra.mxu1 %v1045_v63  ;;  %v935_v7 = vadd.f32 %v934_v0, %v3656_v1 }
 0x188   : > { %v1018_v6 = vmax.f32 %v883_v2, 0.0  ;;  %v984_v12 = vadd.f32 %v983_v3, %v935_v7 }
 0x18a   : > { %v1044_v8 = vpack.c.bf16 %v1018_v6, %v1016_v4  ;;  %v1021_v17 = vmax.f32 %v984_v12, 0.0 }
 0x18b   : > { %v836_v9 = vpop.f32.mrf.mxu2 }
 0x18c   : > { %v885_v10 = vpop.f32.mrf.mxu3  ;;  %1272 = vmatmul.bf16.gmra.mxu2 %v1044_v8  ;;  %1370 = vmatmul.bf16.gmra.mxu0 %v1044_v8  ;;  %v837_v15 = vadd.f32 %v836_v9, %v3659_v5 }
 0x18d   : > { %v936_v11 = vpop.f32.mrf.mxu0 }
 0x18e   : > { %v937_v13 = vadd.f32 %v936_v11, %v3656_v1  ;;  %v985_v14 = vpop.f32.mrf.mxu1  ;;  %v886_v20 = vadd.f32 %v885_v10, %v837_v15 }
 0x190   : > { %v986_v16 = vadd.f32 %v985_v14, %v937_v13  ;;  %v1020_v27 = vmax.f32 %v886_v20, 0.0 }
 0x192   : > { %v1023_v18 = vmax.f32 %v986_v16, 0.0 }
 0x193   : > { %v838_v19 = vpop.f32.mrf.mxu2 }
 0x194   : > { %v839_v21 = vadd.f32 %v838_v19, %v3659_v5  ;;  %v887_v22 = vpop.f32.mrf.mxu3  ;;  %v1047_v23 = vpack.c.bf16 %v1023_v18, %v1021_v17 }
 0x195   : > { %v939_v24 = vpop.f32.mrf.mxu0 }
 0x196   : > { %v888_v25 = vadd.f32 %v887_v22, %v839_v21  ;;  %v988_v26 = vpop.f32.mrf.mxu1  ;;  %1326 = vmatmul.bf16.gmra.mxu3 %v1047_v23  ;;  %1424 = vmatmul.bf16.gmra.mxu1 %v1047_v23  ;;  %v940_v29 = vadd.f32 %v939_v24, %v3656_v1 }
 0x198   : > { %v1022_v28 = vmax.f32 %v888_v25, 0.0  ;;  %v989_v34 = vadd.f32 %v988_v26, %v940_v29 }
 0x19a   : > { %v1046_v30 = vpack.c.bf16 %v1022_v28, %v1020_v27  ;;  %v1025_v39 = vmax.f32 %v989_v34, 0.0 }
 0x19b   : > { %v841_v31 = vpop.f32.mrf.mxu2 }
 0x19c   : > { %v890_v32 = vpop.f32.mrf.mxu3  ;;  %1277 = vmatmul.bf16.gmra.mxu2 %v1046_v30  ;;  %1375 = vmatmul.bf16.gmra.mxu0 %v1046_v30  ;;  %v842_v37 = vadd.f32 %v841_v31, %v3659_v5 }
 0x19d   : > { %v941_v33 = vpop.f32.mrf.mxu0 }
 0x19e   : > { %v942_v35 = vadd.f32 %v941_v33, %v3656_v1  ;;  %v990_v36 = vpop.f32.mrf.mxu1  ;;  %v891_v43 = vadd.f32 %v890_v32, %v842_v37 }
 0x1a0   : > { %v991_v38 = vadd.f32 %v990_v36, %v942_v35  ;;  %v1024_v49 = vmax.f32 %v891_v43, 0.0 }
 0x1a2   : > { %v1027_v40 = vmax.f32 %v991_v38, 0.0 }
 0x1a3   : > { %v843_v41 = vpop.f32.mrf.mxu2 }
 0x1a4   : > { %v1049_v42 = vpack.c.bf16 %v1027_v40, %v1025_v39  ;;  %v844_v45 = vadd.f32 %v843_v41, %v3659_v5  ;;  %v892_v44 = vpop.f32.mrf.mxu3 }
 0x1a5   : > { %v944_v46 = vpop.f32.mrf.mxu0 }
 0x1a6   : > { %v893_v47 = vadd.f32 %v892_v44, %v844_v45  ;;  %v993_v48 = vpop.f32.mrf.mxu1  ;;  %1331 = vmatmul.bf16.gmra.mxu3 %v1049_v42  ;;  %1429 = vmatmul.bf16.gmra.mxu1 %v1049_v42  ;;  %v945_v52 = vadd.f32 %v944_v46, %v3656_v1 }
 0x1a8   : > { %v1026_v50 = vmax.f32 %v893_v47, 0.0  ;;  %v994_v56 = vadd.f32 %v993_v48, %v945_v52 }
 0x1aa   : > { %v1048_v51 = vpack.c.bf16 %v1026_v50, %v1024_v49  ;;  %v1029_v61 = vmax.f32 %v994_v56, 0.0 }
 0x1ab   : > { %v846_v53 = vpop.f32.mrf.mxu2 }
 0x1ac   : > { %v895_v54 = vpop.f32.mrf.mxu3  ;;  %1282 = vmatmul.bf16.gmra.mxu2 %v1048_v51  ;;  %1380 = vmatmul.bf16.gmra.mxu0 %v1048_v51  ;;  %v847_v59 = vadd.f32 %v846_v53, %v3659_v5 }
 0x1ad   : > { %v946_v55 = vpop.f32.mrf.mxu0 }
 0x1ae   : > { %v947_v57 = vadd.f32 %v946_v55, %v3656_v1  ;;  %v995_v58 = vpop.f32.mrf.mxu1  ;;  %v896_v0 = vadd.f32 %v895_v54, %v847_v59  ;;  %v1088_v54 = vld [vmem:[%s4126_s6] sm:$0x3] }
 0x1af   : > { %v3695_v55 = vperm.slane %v1088_v54, 1 }
 0x1b0   : > { %v996_v60 = vadd.f32 %v995_v58, %v947_v57  ;;  %v1028_v9 = vmax.f32 %v896_v0, 0.0 }
 0x1b2   : > { %v1031_v62 = vmax.f32 %v996_v60, 0.0  ;;  %v3700_v60 = vperm.slane %v1088_v54, 0 }
 0x1b3   : > { %v848_v63 = vpop.f32.mrf.mxu2 }
 0x1b4   : > { %v1051_v2 = vpack.c.bf16 %v1031_v62, %v1029_v61  ;;  %v849_v3 = vadd.f32 %v848_v63, %v3659_v5  ;;  %v897_v4 = vpop.f32.mrf.mxu3 }
 0x1b5   : > { %v949_v6 = vpop.f32.mrf.mxu0 }
 0x1b6   : > { %v898_v7 = vadd.f32 %v897_v4, %v849_v3  ;;  %v998_v8 = vpop.f32.mrf.mxu1  ;;  %1336 = vmatmul.bf16.gmra.mxu3 %v1051_v2  ;;  %1434 = vmatmul.bf16.gmra.mxu1 %v1051_v2  ;;  %v950_v12 = vadd.f32 %v949_v6, %v3656_v1  ;;  %v1806_v3 = vld [vmem:[%s3112_s20] sm:$0xff] }
 0x1b8   : > { %v1030_v10 = vmax.f32 %v898_v7, 0.0  ;;  %v999_v16 = vadd.f32 %v998_v8, %v950_v12 }
 0x1ba   : > { %v1050_v11 = vpack.c.bf16 %v1030_v10, %v1028_v9  ;;  %v1033_v21 = vmax.f32 %v999_v16, 0.0 }
 0x1bb   : > { %v851_v13 = vpop.f32.mrf.mxu2 }
 0x1bc   : > { %v900_v14 = vpop.f32.mrf.mxu3  ;;  %1287 = vmatmul.bf16.gmra.mxu2 %v1050_v11  ;;  %1385 = vmatmul.bf16.gmra.mxu0 %v1050_v11  ;;  %v852_v19 = vadd.f32 %v851_v13, %v3659_v5 }
 0x1bd   : > { %v951_v15 = vpop.f32.mrf.mxu0 }
 0x1be   : > { %v952_v17 = vadd.f32 %v951_v15, %v3656_v1  ;;  %v1000_v18 = vpop.f32.mrf.mxu1  ;;  %v901_v24 = vadd.f32 %v900_v14, %v852_v19 }
 0x1c0   : > { %v1001_v20 = vadd.f32 %v1000_v18, %v952_v17  ;;  %v1032_v31 = vmax.f32 %v901_v24, 0.0  ;;  %v1807_v18 = vld [vmem:[%s3112_s20 + $0x8] sm:$0xff] }
 0x1c2   : > { %v1035_v22 = vmax.f32 %v1001_v20, 0.0 }
 0x1c3   : > { %v853_v23 = vpop.f32.mrf.mxu2 }
 0x1c4   : > { %v1053_v25 = vpack.c.bf16 %v1035_v22, %v1033_v21  ;;  %v854_v26 = vadd.f32 %v853_v23, %v3659_v5  ;;  %v902_v27 = vpop.f32.mrf.mxu3 }
 0x1c5   : > { %v954_v28 = vpop.f32.mrf.mxu0 }
 0x1c6   : > { %v903_v29 = vadd.f32 %v902_v27, %v854_v26  ;;  %v1003_v30 = vpop.f32.mrf.mxu1  ;;  %1341 = vmatmul.bf16.gmra.mxu3 %v1053_v25  ;;  %1439 = vmatmul.bf16.gmra.mxu1 %v1053_v25  ;;  %v955_v34 = vadd.f32 %v954_v28, %v3656_v1  ;;  %v1450_v28 = vlaneseq }
 0x1c8   : > { %v1034_v32 = vmax.f32 %v903_v29, 0.0  ;;  %v1004_v38 = vadd.f32 %v1003_v30, %v955_v34 }
 0x1ca   : > { %v1052_v33 = vpack.c.bf16 %v1034_v32, %v1032_v31  ;;  %v1037_v42 = vmax.f32 %v1004_v38, 0.0 }
 0x1cb   : > { %v856_v35 = vpop.f32.mrf.mxu2 }
 0x1cc   : > { %v905_v36 = vpop.f32.mrf.mxu3  ;;  %1292 = vmatmul.bf16.gmra.mxu2 %v1052_v33  ;;  %1390 = vmatmul.bf16.gmra.mxu0 %v1052_v33  ;;  %v857_v41 = vadd.f32 %v856_v35, %v3659_v5  ;;  %v1808_v35 = vld [vmem:[%s3112_s20 + $0x10] sm:$0xff] }
 0x1cd   : > { %v956_v37 = vpop.f32.mrf.mxu0 }
 0x1ce   : > { %v957_v39 = vadd.f32 %v956_v37, %v3656_v1  ;;  %v1005_v40 = vpop.f32.mrf.mxu1  ;;  %v906_v46 = vadd.f32 %v905_v36, %v857_v41 }
 0x1d0   : > { %v1006_v43 = vadd.f32 %v1005_v40, %v957_v39  ;;  %v1036_v51 = vmax.f32 %v906_v46, 0.0  ;;  %v3738_v39 = vand.u32 127, %v1450_v28 }
 0x1d2   : > { %v1039_v45 = vmax.f32 %v1006_v43, 0.0  ;;  %vm1452_vm2 = vcmp.eq.s32.totalorder %v3738_v39, 3 }
 0x1d3   : > { %v858_v44 = vpop.f32.mrf.mxu2 }
 0x1d4   : > { %v1055_v47 = vpack.c.bf16 %v1039_v45, %v1037_v42  ;;  %v859_v48 = vadd.f32 %v858_v44, %v3659_v5  ;;  %v907_v49 = vpop.f32.mrf.mxu3 }
 0x1d6   : > { %v908_v50 = vadd.f32 %v907_v49, %v859_v48  ;;  %1346 = vmatmul.bf16.gmra.mxu3 %v1055_v47  ;;  %1444 = vmatmul.bf16.gmra.mxu1 %v1055_v47 }
 0x1d8   : > { %v1038_v52 = vmax.f32 %v908_v50, 0.0 }
 0x1da   : > { %v1054_v53 = vpack.c.bf16 %v1038_v52, %v1036_v51 }
 0x1dc   : > { %1297 = vmatmul.bf16.gmra.mxu2 %v1054_v53  ;;  %1395 = vmatmul.bf16.gmra.mxu0 %v1054_v53 }
 0x1e3   : > { %v1410_v1 = vpop.f32.mrf.mxu1 }
 0x1e9   : > { %v1312_v56 = vpop.f32.mrf.mxu3  ;;  %v1361_v57 = vpop.f32.mrf.mxu0 }
 0x1ea   : > { %v1362_v5 = vadd.f32 %v1361_v57, %v3695_v55 }
 0x1eb   : > { %v1412_v58 = vpop.f32.mrf.mxu1 }
 0x1ec   : > { %v3698_v59 = vadd.f32 %v1410_v1, %v1362_v5 }
 0x1ee   : > { %v2564_v61 = vmul.f32 -1.442695, %v3698_v59 }
 0x1ef   : > { %v1263_v62 = vpop.f32.mrf.mxu2 }
 0x1f0   : > { %2780 = vpow2.f32 %v2564_v61  ;;  %v1264_v63 = vadd.f32 %v1263_v62, %v3700_v60 }
 0x1f1   : > { %v1314_v0 = vpop.f32.mrf.mxu3  ;;  %v1363_v2 = vpop.f32.mrf.mxu0 }
 0x1f2   : > { %v1313_v4 = vadd.f32 %v1312_v56, %v1264_v63  ;;  %v1364_v6 = vadd.f32 %v1363_v2, %v3695_v55 }
 0x1f3   : > { %v1415_v7 = vpop.f32.mrf.mxu1 }
 0x1f4   : > { %v3706_v8 = vadd.f32 %v1412_v58, %v1364_v6  ;;  %v3708_v9 = vadd.f32 %v1806_v3, %v1313_v4 }
 0x1f6   : > { %v2781_v10 = vpop.eup %2780  ;;  %v2565_v11 = vmul.f32 -1.442695, %v3706_v8  ;;  %v1838_v12 = vmul.f32 %v3708_v9, %v3708_v9 }
 0x1f7   : > { %v1501_v13 = vadd.f32 1.0, %v2781_v10  ;;  %v1265_v14 = vpop.f32.mrf.mxu2  ;;  %v1809_v10 = vld [vmem:[%s3112_s20 + $0x18] sm:$0xff] }
 0x1f8   : > { %2782 = vpow2.f32 %v2565_v11  ;;  %v1266_v15 = vadd.f32 %v1265_v14, %v3700_v60  ;;  %1854 = vadd.xlane.f32.xlu0 %v1838_v12 }
 0x1f9   : > { %2784 = vrcp.f32 %v1501_v13  ;;  %v1317_v16 = vpop.f32.mrf.mxu3  ;;  %v1366_v17 = vpop.f32.mrf.mxu0  ;;  %v1526_v40 = vand.u32 2147483647, %v1501_v13  ;;  %v1528_v41 = vand.u32 2147483648, %v1501_v13  ;;  %vm1522_vm1 = vweird.f32 %v1501_v13 }
 0x1fa   : > { %v1315_v19 = vadd.f32 %v1314_v0, %v1266_v15  ;;  %v1367_v20 = vadd.f32 %v1366_v17, %v3695_v55 }
 0x1fb   : > { %v1417_v21 = vpop.f32.mrf.mxu1  ;;  %v1529_v51 = vor.u32 1.1754944e-38, %v1528_v41  ;;  %vm1527_vm4 = vcmp.eq.f32.partialorder %v1526_v40, 8.507059e+37 }
 0x1fc   : > { %v3717_v22 = vadd.f32 %v1415_v7, %v1367_v20  ;;  %v3719_v23 = vadd.f32 %v1807_v18, %v1315_v19 }
 0x1fe   : > { %v2783_v24 = vpop.eup %2782  ;;  %v2566_v25 = vmul.f32 -1.442695, %v3717_v22  ;;  %v1839_v26 = vmul.f32 %v3719_v23, %v3719_v23 }
 0x1ff   : > { %v2785_v27 = vpop.eup %2784  ;;  %v3728_v29 = vadd.f32 1.0, %v2783_v24  ;;  %v1268_v30 = vpop.f32.mrf.mxu2 }
 0x200   : > { %v1518_v31 = vmul.f32 %v2785_v27, %v1501_v13  ;;  %2786 = vpow2.f32 %v2566_v25  ;;  %v1269_v32 = vadd.f32 %v1268_v30, %v3700_v60  ;;  %1856 = vadd.xlane.f32.xlu0 %v1839_v26  ;;  %vm1523_vm0 = vweird.f32 %v2785_v27 }
 0x201   : > { %2788 = vrcp.f32 %v3728_v29  ;;  %v1319_v33 = vpop.f32.mrf.mxu3  ;;  %v1368_v34 = vpop.f32.mrf.mxu0  ;;  %vm1524_vm3 = vmor %vm1522_vm1, %vm1523_vm0  ;;  %v1543_v0 = vand.u32 2147483648, %v3728_v29  ;;  %v1541_v6 = vand.u32 2147483647, %v3728_v29  ;;  %vm1537_vm7 = vweird.f32 %v3728_v29 }
 0x202   : > { %v1519_v36 = vsub.f32 1.0, %v1518_v31  ;;  %v1318_v37 = vadd.f32 %v1317_v16, %v1269_v32  ;;  %v1369_v38 = vadd.f32 %v1368_v34, %v3695_v55 }
 0x203   : > { %v1420_v43 = vpop.f32.mrf.mxu1  ;;  %v1544_v14 = vor.u32 1.1754944e-38, %v1543_v0  ;;  %vm1542_vm9 = vcmp.eq.f32.partialorder %v1541_v6, 8.507059e+37  ;;  %v1811_v0 = vld [vmem:[%s3112_s20 + $0x28] sm:$0xff] }
 0x204   : > { %v1520_v42 = vmul.f32 %v2785_v27, %v1519_v36  ;;  %v3740_v45 = vadd.f32 %v1417_v21, %v1369_v38  ;;  %v3742_v44 = vadd.f32 %v1808_v35, %v1318_v37 }
 0x206   : > { %v2787_v46 = vpop.eup %2786  ;;  %v1521_v47 = vadd.f32 %v2785_v27, %v1520_v42  ;;  %v2567_v48 = vmul.f32 -1.442695, %v3740_v45  ;;  %v1840_v49 = vmul.f32 %v3742_v44, %v3742_v44 }
 0x207   : > { %v2789_v50 = vpop.eup %2788  ;;  %v3749_v52 = vadd.f32 1.0, %v2787_v46  ;;  %v1270_v53 = vpop.f32.mrf.mxu2 }
 0x208   : > { %v1525_v1 = vsel %vm1524_vm3, %v2785_v27, %v1521_v47  ;;  %v1533_v54 = vmul.f32 %v2789_v50, %v3728_v29  ;;  %2790 = vpow2.f32 %v2567_v48  ;;  %1858 = vadd.xlane.f32.xlu1 %v1840_v49  ;;  %v1271_v62 = vadd.f32 %v1270_v53, %v3700_v60  ;;  %v1810_v29 = vld [vmem:[%s3112_s20 + $0x20] sm:$0xff] }
 0x209   : > { %v1530_v56 = vsel %vm1527_vm4, %v1529_v51, %v1525_v1  ;;  %2792 = vrcp.f32 %v3749_v52  ;;  %v1322_v57 = vpop.f32.mrf.mxu3  ;;  %v1371_v5 = vpop.f32.mrf.mxu0  ;;  %vm1538_vm6 = vweird.f32 %v2789_v50  ;;  %v1558_v31 = vand.u32 2147483648, %v3749_v52 }
 0x20a   : > { %v1757_v58 = vsel %vm1452_vm2, %v1530_v56, %v3698_v59  ;;  %v1534_v61 = vsub.f32 1.0, %v1533_v54  ;;  %v1372_v2 = vadd.f32 %v1371_v5, %v3695_v55  ;;  %v1320_v7 = vadd.f32 %v1319_v33, %v1271_v62  ;;  %vm1539_vm8 = vmor %vm1537_vm7, %vm1538_vm6 }
 0x20b   : > { %v1773_v63 = vpack.c.bf16 %v1757_v58, %v1757_v58  ;;  %v1422_v3 = vpop.f32.mrf.mxu1  ;;  %v1556_v36 = vand.u32 2147483647, %v3749_v52  ;;  %vm1552_vm11 = vweird.f32 %v3749_v52 }
 0x20c   : > { %v1535_v4 = vmul.f32 %v2789_v50, %v1534_v61  ;;  %v3768_v11 = vadd.f32 %v1420_v43, %v1372_v2  ;;  %v3774_v18 = vadd.f32 %v1809_v10, %v1320_v7  ;;  %v1559_v43 = vor.u32 1.1754944e-38, %v1558_v31 }
 0x20d   : > { %1790 = vst.msk [vmem:[%s3756_s22] sm:$0xf] %vm1789_vm5, %v1773_v63  ;;  %vm1557_vm13 = vcmp.eq.f32.partialorder %v1556_v36, 8.507059e+37 }
 0x20e   : > { %v2791_v59 = vpop.eup %2790  ;;  %v1536_v12 = vadd.f32 %v2789_v50, %v1535_v4  ;;  %v2568_v16 = vmul.f32 -1.442695, %v3768_v11  ;;  %v1841_v33 = vmul.f32 %v3774_v18, %v3774_v18 }
 0x20f   : > { %v2793_v13 = vpop.eup %2792  ;;  %v3771_v15 = vadd.f32 1.0, %v2791_v59  ;;  %v1273_v17 = vpop.f32.mrf.mxu2 }
 0x210   : > { %v1540_v19 = vsel %vm1539_vm8, %v2789_v50, %v1536_v12  ;;  %v1548_v20 = vmul.f32 %v2793_v13, %v3749_v52  ;;  %v1274_v21 = vadd.f32 %v1273_v17, %v3700_v60  ;;  %vm1553_vm10 = vweird.f32 %v2793_v13  ;;  %1860 = vadd.xlane.f32.xlu1 %v1841_v33 }
 0x211   : > { %v1545_v24 = vsel %vm1542_vm9, %v1544_v14, %v1540_v19  ;;  %2794 = vrcp.f32 %v3771_v15  ;;  %v1324_v25 = vpop.f32.mrf.mxu3  ;;  %v1373_v26 = vpop.f32.mrf.mxu0  ;;  %vm1554_vm12 = vmor %vm1552_vm11, %vm1553_vm10  ;;  %v1571_v61 = vand.u32 2147483647, %v3771_v15  ;;  %v1573_v62 = vand.u32 2147483648, %v3771_v15 }
 0x212   : > { %v1758_v27 = vsel %vm1452_vm2, %v1545_v24, %v3706_v8  ;;  %v1549_v28 = vsub.f32 1.0, %v1548_v20  ;;  %2796 = vpow2.f32 %v2568_v16  ;;  %v1323_v32 = vadd.f32 %v1322_v57, %v1274_v21  ;;  %v1812_v24 = vld [vmem:[%s3112_s20 + $0x30] sm:$0xff] }
 0x213   : > { %v1774_v30 = vpack.c.bf16 %v1758_v27, %v1758_v27  ;;  %v1425_v34 = vpop.f32.mrf.mxu1  ;;  %v1374_v37 = vadd.f32 %v1373_v26, %v3695_v55  ;;  %vm1567_vm15 = vweird.f32 %v3771_v15  ;;  %vm1572_vm1 = vcmp.eq.f32.partialorder %v1571_v61, 8.507059e+37 }
 0x214   : > { %v1550_v35 = vmul.f32 %v2793_v13, %v1549_v28  ;;  %v3790_v8 = vadd.f32 %v1810_v29, %v1323_v32  ;;  %v1574_v10 = vor.u32 1.1754944e-38, %v1573_v62 }
 0x215   : > { %1791 = vst.msk [vmem:[%s3756_s22 + $0x4] sm:$0xf] %vm1789_vm5, %v1774_v30  ;;  %v3793_v40 = vadd.f32 %v1422_v3, %v1374_v37 }
 0x216   : > { %v1551_v38 = vadd.f32 %v2793_v13, %v1550_v35  ;;  %v1842_v46 = vmul.f32 %v3790_v8, %v3790_v8 }
 0x217   : > { %v2795_v41 = vpop.eup %2794  ;;  %v1275_v42 = vpop.f32.mrf.mxu2  ;;  %v2569_v50 = vmul.f32 -1.442695, %v3793_v40 }
 0x218   : > { %v2797_v47 = vpop.eup %2796  ;;  %v1555_v48 = vsel %vm1554_vm12, %v2793_v13, %v1551_v38  ;;  %v1563_v49 = vmul.f32 %v2795_v41, %v3771_v15  ;;  %v1276_v52 = vadd.f32 %v1275_v42, %v3700_v60  ;;  %1862 = vadd.xlane.f32.xlu2 %v1842_v46  ;;  %vm1568_vm14 = vweird.f32 %v2795_v41 }
 0x219   : > { %v1560_v51 = vsel %vm1557_vm13, %v1559_v43, %v1555_v48  ;;  %v3799_v53 = vadd.f32 1.0, %v2797_v47  ;;  %v1327_v1 = vpop.f32.mrf.mxu3  ;;  %v1376_v54 = vpop.f32.mrf.mxu0  ;;  %2798 = vpow2.f32 %v2569_v50  ;;  %vm1569_vm0 = vmor %vm1567_vm15, %vm1568_vm14 }
 0x21a   : > { %v1759_v56 = vsel %vm1452_vm2, %v1560_v51, %v3717_v22  ;;  %v1564_v57 = vsub.f32 1.0, %v1563_v49  ;;  %v1377_v5 = vadd.f32 %v1376_v54, %v3695_v55  ;;  %v1325_v3 = vadd.f32 %v1324_v25, %v1276_v52 }
 0x21b   : > { %v1775_v58 = vpack.c.bf16 %v1759_v56, %v1759_v56  ;;  %2800 = vrcp.f32 %v3799_v53  ;;  %v1427_v63 = vpop.f32.mrf.mxu1  ;;  %v1586_v33 = vand.u32 2147483647, %v3799_v53  ;;  %vm1582_vm4 = vweird.f32 %v3799_v53 }
 0x21c   : > { %v1565_v2 = vmul.f32 %v2795_v41, %v1564_v57  ;;  %v3810_v4 = vadd.f32 %v1425_v34, %v1377_v5  ;;  %v3816_v7 = vadd.f32 %v1811_v0, %v1325_v3  ;;  %v1588_v34 = vand.u32 2147483648, %v3799_v53 }
 0x21d   : > { %1792 = vst.msk [vmem:[%s3756_s22 + $0x8] sm:$0xf] %vm1789_vm5, %v1775_v58  ;;  %vm1587_vm7 = vcmp.eq.f32.partialorder %v1586_v33, 8.507059e+37 }
 0x21e   : > { %v1566_v22 = vadd.f32 %v2795_v41, %v1565_v2  ;;  %v2570_v6 = vmul.f32 -1.442695, %v3810_v4  ;;  %v1843_v16 = vmul.f32 %v3816_v7, %v3816_v7  ;;  %v1589_v48 = vor.u32 1.1754944e-38, %v1588_v34 }
 0x21f   : > { %v1278_v59 = vpop.f32.mrf.mxu2  ;;  %v2799_v12 = vpop.eup %2798 }
 0x220   : > { %v1570_v13 = vsel %vm1569_vm0, %v2795_v41, %v1566_v22  ;;  %2802 = vpow2.f32 %v2570_v6  ;;  %v1279_v14 = vadd.f32 %v1278_v59, %v3700_v60  ;;  %v3821_v19 = vadd.f32 1.0, %v2799_v12  ;;  %1864 = vadd.xlane.f32.xlu2 %v1843_v16 }
 0x221   : > { %v2801_v17 = vpop.eup %2800  ;;  %v1575_v15 = vsel %vm1572_vm1, %v1574_v10, %v1570_v13  ;;  %v1329_v20 = vpop.f32.mrf.mxu3 }
 0x222   : > { %v1378_v21 = vpop.f32.mrf.mxu0  ;;  %v1760_v25 = vsel %vm1452_vm2, %v1575_v15, %v3740_v45  ;;  %v1578_v26 = vmul.f32 %v2801_v17, %v3799_v53  ;;  %v1328_v27 = vadd.f32 %v1327_v1, %v1279_v14  ;;  %2804 = vrcp.f32 %v3821_v19  ;;  %v1813_v1 = vld [vmem:[%s3112_s20 + $0x38] sm:$0xff] }
 0x223   : > { %v1776_v28 = vpack.c.bf16 %v1760_v25, %v1760_v25  ;;  %v1430_v29 = vpop.f32.mrf.mxu1  ;;  %v1379_v31 = vadd.f32 %v1378_v21, %v3695_v55  ;;  %vm1583_vm3 = vweird.f32 %v2801_v17  ;;  %v1601_v62 = vand.u32 2147483647, %v3821_v19 }
 0x224   : > { %v1579_v30 = vsub.f32 1.0, %v1578_v26  ;;  %v3830_v32 = vadd.f32 %v1812_v24, %v1328_v27  ;;  %vm1584_vm6 = vmor %vm1582_vm4, %vm1583_vm3  ;;  %vm1597_vm9 = vweird.f32 %v3821_v19 }
 0x225   : > { %1793 = vst.msk [vmem:[%s3756_s22 + $0xc] sm:$0xf] %vm1789_vm5, %v1776_v28  ;;  %v3836_v36 = vadd.f32 %v1427_v63, %v1379_v31  ;;  %v1603_v63 = vand.u32 2147483648, %v3821_v19  ;;  %vm1602_vm11 = vcmp.eq.f32.partialorder %v1601_v62, 8.507059e+37 }
 0x226   : > { %v2803_v45 = vpop.eup %2802  ;;  %v1580_v35 = vmul.f32 %v2801_v17, %v1579_v30  ;;  %v1844_v37 = vmul.f32 %v3830_v32, %v3830_v32 }
 0x227   : > { %v3840_v38 = vadd.f32 1.0, %v2803_v45  ;;  %v1280_v41 = vpop.f32.mrf.mxu2  ;;  %v2571_v42 = vmul.f32 -1.442695, %v3836_v36  ;;  %v1604_v14 = vor.u32 1.1754944e-38, %v1603_v63 }
 0x228   : > { %v1581_v43 = vadd.f32 %v2801_v17, %v1580_v35  ;;  %v1281_v46 = vadd.f32 %v1280_v41, %v3700_v60  ;;  %1866 = vadd.xlane.f32.xlu0 %v1844_v37  ;;  %v2805_v47 = vpop.eup %2804 }
 0x229   : > { %2806 = vrcp.f32 %v3840_v38  ;;  %v1332_v49 = vpop.f32.mrf.mxu3  ;;  %v1593_v52 = vmul.f32 %v2805_v47, %v3821_v19  ;;  %vm1598_vm8 = vweird.f32 %v2805_v47  ;;  %v1616_v26 = vand.u32 2147483647, %v3840_v38 }
 0x22a   : > { %v1381_v50 = vpop.f32.mrf.mxu0  ;;  %v1585_v51 = vsel %vm1584_vm6, %v2801_v17, %v1581_v43  ;;  %2808 = vpow2.f32 %v2571_v42  ;;  %v1330_v54 = vadd.f32 %v1329_v20, %v1281_v46  ;;  %vm1599_vm10 = vmor %vm1597_vm9, %vm1598_vm8  ;;  %v1618_v27 = vand.u32 2147483648, %v3840_v38 }
 0x22b   : > { %v1590_v53 = vsel %vm1587_vm7, %v1589_v48, %v1585_v51  ;;  %v1432_v56 = vpop.f32.mrf.mxu1  ;;  %v1594_v5 = vsub.f32 1.0, %v1593_v52  ;;  %v1382_v58 = vadd.f32 %v1381_v50, %v3695_v55  ;;  %vm1612_vm13 = vweird.f32 %v3840_v38 }
 0x22c   : > { %v1761_v57 = vsel %vm1452_vm2, %v1590_v53, %v3768_v11  ;;  %v3854_v0 = vadd.f32 %v1813_v1, %v1330_v54  ;;  %v1619_v41 = vor.u32 1.1754944e-38, %v1618_v27  ;;  %vm1617_vm15 = vcmp.eq.f32.partialorder %v1616_v26, 8.507059e+37  ;;  %v1815_v1 = vld [vmem:[%s3112_s20 + $0x48] sm:$0xff] }
 0x22d   : > { %v1777_v61 = vpack.c.bf16 %v1761_v57, %v1761_v57  ;;  %v1595_v2 = vmul.f32 %v2805_v47, %v1594_v5  ;;  %v3856_v3 = vadd.f32 %v1430_v29, %v1382_v58  ;;  %v1814_v29 = vld [vmem:[%s3112_s20 + $0x40] sm:$0xff] }
 0x22e   : > { %v1845_v11 = vmul.f32 %v3854_v0, %v3854_v0 }
 0x22f   : > { %v2807_v22 = vpop.eup %2806  ;;  %1794 = vst.msk [vmem:[%s3756_s22 + $0x10] sm:$0xf] %vm1789_vm5, %v1777_v61  ;;  %v1283_v6 = vpop.f32.mrf.mxu2  ;;  %v1596_v59 = vadd.f32 %v2805_v47, %v1595_v2  ;;  %v2572_v13 = vmul.f32 -1.442695, %v3856_v3 }
 0x230   : > { %v2809_v10 = vpop.eup %2808  ;;  %v1608_v12 = vmul.f32 %v2807_v22, %v3840_v38  ;;  %v1284_v17 = vadd.f32 %v1283_v6, %v3700_v60  ;;  %1868 = vadd.xlane.f32.xlu1 %v1845_v11  ;;  %vm1613_vm12 = vweird.f32 %v2807_v22 }
 0x231   : > { %v3865_v16 = vadd.f32 1.0, %v2809_v10  ;;  %v1334_v15 = vpop.f32.mrf.mxu3  ;;  %v1600_v21 = vsel %vm1599_vm10, %v2805_v47, %v1596_v59  ;;  %2810 = vpow2.f32 %v2572_v13  ;;  %vm1614_vm14 = vmor %vm1612_vm13, %vm1613_vm12 }
 0x232   : > { %v1383_v20 = vpop.f32.mrf.mxu0  ;;  %v1609_v24 = vsub.f32 1.0, %v1608_v12  ;;  %v1605_v25 = vsel %vm1602_vm11, %v1604_v14, %v1600_v21  ;;  %v1333_v33 = vadd.f32 %v1332_v49, %v1284_v17 }
 0x233   : > { %v1384_v19 = vadd.f32 %v1383_v20, %v3695_v55  ;;  %2812 = vrcp.f32 %v3865_v16  ;;  %v1435_v28 = vpop.f32.mrf.mxu1  ;;  %v1762_v30 = vsel %vm1452_vm2, %v1605_v25, %v3793_v40  ;;  %v1631_v63 = vand.u32 2147483647, %v3865_v16  ;;  %v1816_v25 = vld [vmem:[%s3112_s20 + $0x50] sm:$0xff] }
 0x234   : > { %v1610_v31 = vmul.f32 %v2807_v22, %v1609_v24  ;;  %v1778_v34 = vpack.c.bf16 %v1762_v30, %v1762_v30  ;;  %v3879_v37 = vadd.f32 %v1814_v29, %v1333_v33  ;;  %v1633_v2 = vand.u32 2147483648, %v3865_v16 }
 0x235   : > { %v3876_v45 = vadd.f32 %v1432_v56, %v1384_v19  ;;  %vm1627_vm1 = vweird.f32 %v3865_v16  ;;  %vm1632_vm4 = vcmp.eq.f32.partialorder %v1631_v63, 8.507059e+37 }
 0x236   : > { %v1611_v35 = vadd.f32 %v2807_v22, %v1610_v31  ;;  %1795 = vst.msk [vmem:[%s3756_s22 + $0x14] sm:$0xf] %vm1789_vm5, %v1778_v34  ;;  %v1846_v48 = vmul.f32 %v3879_v37, %v3879_v37 }
 0x237   : > { %v2573_v43 = vmul.f32 -1.442695, %v3876_v45  ;;  %v1285_v42 = vpop.f32.mrf.mxu2  ;;  %v2811_v40 = vpop.eup %2810 }
 0x238   : > { %v1615_v46 = vsel %vm1614_vm14, %v2807_v22, %v1611_v35  ;;  %v1286_v47 = vadd.f32 %v1285_v42, %v3700_v60  ;;  %v3887_v50 = vadd.f32 1.0, %v2811_v40  ;;  %1870 = vadd.xlane.f32.xlu2 %v1846_v48 }
 0x239   : > { %v2813_v49 = vpop.eup %2812  ;;  %v1620_v38 = vsel %vm1617_vm15, %v1619_v41, %v1615_v46  ;;  %2814 = vpow2.f32 %v2573_v43  ;;  %v1337_v51 = vpop.f32.mrf.mxu3 }
 0x23a   : > { %v1386_v52 = vpop.f32.mrf.mxu0  ;;  %v1763_v53 = vsel %vm1452_vm2, %v1620_v38, %v3810_v4  ;;  %v1623_v54 = vmul.f32 %v2813_v49, %v3865_v16  ;;  %v1335_v56 = vadd.f32 %v1334_v15, %v1286_v47  ;;  %2816 = vrcp.f32 %v3887_v50 }
 0x23b   : > { %v1779_v57 = vpack.c.bf16 %v1763_v53, %v1763_v53  ;;  %v1437_v5 = vpop.f32.mrf.mxu1  ;;  %v1387_v61 = vadd.f32 %v1386_v52, %v3695_v55  ;;  %vm1628_vm0 = vweird.f32 %v2813_v49  ;;  %v1634_v15 = vor.u32 1.1754944e-38, %v1633_v2  ;;  %v1817_v52 = vld [vmem:[%s3112_s20 + $0x58] sm:$0xff] }
 0x23c   : > { %v1624_v58 = vsub.f32 1.0, %v1623_v54  ;;  %v3896_v62 = vadd.f32 %v1815_v1, %v1335_v56  ;;  %vm1629_vm3 = vmor %vm1627_vm1, %vm1628_vm0  ;;  %v1646_v30 = vand.u32 2147483647, %v3887_v50  ;;  %v1648_v31 = vand.u32 2147483648, %v3887_v50 }
 0x23d   : > { %1796 = vst.msk [vmem:[%s3756_s22 + $0x18] sm:$0xf] %vm1789_vm5, %v1779_v57  ;;  %v3902_v22 = vadd.f32 %v1435_v28, %v1387_v61  ;;  %vm1642_vm7 = vweird.f32 %v3887_v50 }
 0x23e   : > { %v1625_v4 = vmul.f32 %v2813_v49, %v1624_v58  ;;  %v1847_v6 = vmul.f32 %v3896_v62, %v3896_v62  ;;  %vm1647_vm9 = vcmp.eq.f32.partialorder %v1646_v30, 8.507059e+37  ;;  %v1649_v48 = vor.u32 1.1754944e-38, %v1648_v31 }
 0x23f   : > { %v2815_v11 = vpop.eup %2814  ;;  %v1288_v10 = vpop.f32.mrf.mxu2  ;;  %v2574_v13 = vmul.f32 -1.442695, %v3902_v22 }
 0x240   : > { %v1626_v59 = vadd.f32 %v2813_v49, %v1625_v4  ;;  %v3907_v12 = vadd.f32 1.0, %v2815_v11  ;;  %v1289_v14 = vadd.f32 %v1288_v10, %v3700_v60  ;;  %1872 = vadd.xlane.f32.xlu0 %v1847_v6  ;;  %v2817_v17 = vpop.eup %2816 }
 0x241   : > { %v1638_v24 = vmul.f32 %v2817_v17, %v3887_v50  ;;  %v1339_v16 = vpop.f32.mrf.mxu3  ;;  %vm1643_vm6 = vweird.f32 %v2817_v17 }
 0x242   : > { %v1388_v20 = vpop.f32.mrf.mxu0  ;;  %v1630_v21 = vsel %vm1629_vm3, %v2813_v49, %v1626_v59  ;;  %2818 = vrcp.f32 %v3907_v12  ;;  %v1338_v28 = vadd.f32 %v1337_v51, %v1289_v14  ;;  %vm1644_vm8 = vmor %vm1642_vm7, %vm1643_vm6  ;;  %v1661_v54 = vand.u32 2147483647, %v3907_v12 }
 0x243   : > { %v1635_v19 = vsel %vm1632_vm4, %v1634_v15, %v1630_v21  ;;  %v1639_v27 = vsub.f32 1.0, %v1638_v24  ;;  %2820 = vpow2.f32 %v2574_v13  ;;  %v1389_v33 = vadd.f32 %v1388_v20, %v3695_v55  ;;  %v1440_v34 = vpop.f32.mrf.mxu1 }
 0x244   : > { %v1764_v26 = vsel %vm1452_vm2, %v1635_v19, %v3836_v36  ;;  %v3920_v41 = vadd.f32 %v1816_v25, %v1338_v28  ;;  %v1663_v63 = vand.u32 2147483648, %v3907_v12  ;;  %vm1657_vm11 = vweird.f32 %v3907_v12 }
 0x245   : > { %v1780_v29 = vpack.c.bf16 %v1764_v26, %v1764_v26  ;;  %v1640_v35 = vmul.f32 %v2817_v17, %v1639_v27  ;;  %v3924_v43 = vadd.f32 %v1437_v5, %v1389_v33  ;;  %vm1662_vm13 = vcmp.eq.f32.partialorder %v1661_v54, 8.507059e+37 }
 0x246   : > { %v1848_v47 = vmul.f32 %v3920_v41, %v3920_v41  ;;  %v1664_v15 = vor.u32 1.1754944e-38, %v1663_v63 }
 0x247   : > { %1797 = vst.msk [vmem:[%s3756_s22 + $0x1c] sm:$0xf] %vm1789_vm5, %v1780_v29  ;;  %v1290_v36 = vpop.f32.mrf.mxu2  ;;  %v1641_v40 = vadd.f32 %v2817_v17, %v1640_v35  ;;  %v2575_v38 = vmul.f32 -1.442695, %v3924_v43  ;;  %v1818_v29 = vld [vmem:[%s3112_s20 + $0x60] sm:$0xff] }
 0x248   : > { %v2819_v42 = vpop.eup %2818  ;;  %v1291_v46 = vadd.f32 %v1290_v36, %v3700_v60  ;;  %1874 = vadd.xlane.f32.xlu1 %v1848_v47 }
 0x249   : > { %v1653_v49 = vmul.f32 %v2819_v42, %v3907_v12  ;;  %v2821_v1 = vpop.eup %2820  ;;  %v1645_v53 = vsel %vm1644_vm8, %v2817_v17, %v1641_v40  ;;  %2822 = vpow2.f32 %v2575_v38  ;;  %v1342_v2 = vpop.f32.mrf.mxu3  ;;  %vm1658_vm10 = vweird.f32 %v2819_v42 }
 0x24a   : > { %v1391_v51 = vpop.f32.mrf.mxu0  ;;  %v1340_v56 = vadd.f32 %v1339_v16, %v1291_v46  ;;  %v1650_v57 = vsel %vm1647_vm9, %v1649_v48, %v1645_v53  ;;  %v3935_v58 = vadd.f32 1.0, %v2821_v1  ;;  %vm1659_vm12 = vmor %vm1657_vm11, %vm1658_vm10  ;;  %v1819_v53 = vld [vmem:[%s3112_s20 + $0x68] sm:$0xff] }
 0x24b   : > { %v1392_v50 = vadd.f32 %v1391_v51, %v3695_v55  ;;  %v1654_v5 = vsub.f32 1.0, %v1653_v49  ;;  %v1765_v61 = vsel %vm1452_vm2, %v1650_v57, %v3856_v3  ;;  %v1442_v14 = vpop.f32.mrf.mxu1 }
 0x24c   : > { %v3943_v6 = vadd.f32 %v1817_v52, %v1340_v56  ;;  %v1781_v11 = vpack.c.bf16 %v1765_v61, %v1765_v61  ;;  %2824 = vrcp.f32 %v3935_v58  ;;  %v1676_v40 = vand.u32 2147483647, %v3935_v58 }
 0x24d   : > { %v3941_v4 = vadd.f32 %v1440_v34, %v1392_v50  ;;  %v1655_v10 = vmul.f32 %v2819_v42, %v1654_v5  ;;  %vm1672_vm15 = vweird.f32 %v3935_v58 }
 0x24e   : > { %v1849_v13 = vmul.f32 %v3943_v6, %v3943_v6  ;;  %1798 = vst.msk [vmem:[%s3756_s22 + $0x20] sm:$0xf] %vm1789_vm5, %v1781_v11  ;;  %vm1677_vm1 = vcmp.eq.f32.partialorder %v1676_v40, 8.507059e+37 }
 0x24f   : > { %v2576_v59 = vmul.f32 -1.442695, %v3941_v4  ;;  %v1656_v3 = vadd.f32 %v2819_v42, %v1655_v10  ;;  %v1293_v17 = vpop.f32.mrf.mxu2  ;;  %v2823_v21 = vpop.eup %2822 }
 0x250   : > { %v1294_v20 = vadd.f32 %v1293_v17, %v3700_v60  ;;  %1876 = vadd.xlane.f32.xlu2 %v1849_v13  ;;  %v3953_v25 = vadd.f32 1.0, %v2823_v21 }
 0x251   : > { %2826 = vpow2.f32 %v2576_v59  ;;  %v1660_v24 = vsel %vm1659_vm12, %v2819_v42, %v1656_v3  ;;  %v1344_v36 = vpop.f32.mrf.mxu3 }
 0x252   : > { %v1393_v16 = vpop.f32.mrf.mxu0  ;;  %v1665_v19 = vsel %vm1662_vm13, %v1664_v15, %v1660_v24  ;;  %v1343_v26 = vadd.f32 %v1342_v2, %v1294_v20  ;;  %v2825_v27 = vpop.eup %2824  ;;  %2828 = vrcp.f32 %v3953_v25  ;;  %v1691_v59 = vand.u32 2147483647, %v3953_v25 }
 0x253   : > { %v1394_v12 = vadd.f32 %v1393_v16, %v3695_v55  ;;  %v1766_v28 = vsel %vm1452_vm2, %v1665_v19, %v3876_v45  ;;  %v1668_v31 = vmul.f32 %v2825_v27, %v3935_v58  ;;  %v1678_v45 = vand.u32 2147483648, %v3935_v58  ;;  %v1445_v52 = vpop.f32.mrf.mxu1 }
 0x254   : > { %v1782_v30 = vpack.c.bf16 %v1766_v28, %v1766_v28  ;;  %v3966_v42 = vadd.f32 %v1818_v29, %v1343_v26  ;;  %vm1673_vm14 = vweird.f32 %v2825_v27  ;;  %v1693_v3 = vand.u32 2147483648, %v3953_v25 }
 0x255   : > { %v3962_v33 = vadd.f32 %v1442_v14, %v1394_v12  ;;  %v1669_v35 = vsub.f32 1.0, %v1668_v31  ;;  %vm1674_vm0 = vmor %vm1672_vm15, %vm1673_vm14  ;;  %v1679_v5 = vor.u32 1.1754944e-38, %v1678_v45  ;;  %vm1687_vm4 = vweird.f32 %v3953_v25 }
 0x256   : > { %1799 = vst.msk [vmem:[%s3756_s22 + $0x24] sm:$0xf] %vm1789_vm5, %v1782_v30  ;;  %v1850_v51 = vmul.f32 %v3966_v42, %v3966_v42  ;;  %vm1692_vm6 = vcmp.eq.f32.partialorder %v1691_v59, 8.507059e+37  ;;  %v1694_v29 = vor.u32 1.1754944e-38, %v1693_v3  ;;  %v1821_v59 = vld [vmem:[%s3112_s20 + $0x78] sm:$0xff] }
 0x257   : > { %v2827_v34 = vpop.eup %2826  ;;  %v2577_v47 = vmul.f32 -1.442695, %v3962_v33  ;;  %v1295_v48 = vpop.f32.mrf.mxu2  ;;  %v1670_v49 = vmul.f32 %v2825_v27, %v1669_v35  ;;  %v1820_v35 = vld [vmem:[%s3112_s20 + $0x70] sm:$0xff]  ;;  %s2241_s20 = sshll.u32 %s3108_s26, 6 }
 0x258   : > { %v3970_v46 = vadd.f32 1.0, %v2827_v34  ;;  %v1296_v38 = vadd.f32 %v1295_v48, %v3700_v60  ;;  %v2829_v54 = vpop.eup %2828  ;;  %1878 = vadd.xlane.f32.xlu0 %v1850_v51  ;;  %s4063_s23 = scalar_lea.vmem [#allocation5], %s2241_s20 }
 0x259   : > { %v1671_v56 = vadd.f32 %v2825_v27, %v1670_v49  ;;  %v1683_v61 = vmul.f32 %v2829_v54, %v3953_v25  ;;  %vm1688_vm3 = vweird.f32 %v2829_v54  ;;  %v1347_v26 = vpop.f32.mrf.mxu3  ;;  %s2132_s14 = sshll.u32 %s4063_s23, 4  ;;  %s2133_s14 = int_to_ptr.vmem [resolvable:$true] %s2132_s14 }
 0x25a   : > { %2830 = vrcp.f32 %v3970_v46  ;;  %v1396_v1 = vpop.f32.mrf.mxu0  ;;  %v1345_v50 = vadd.f32 %v1344_v36, %v1296_v38  ;;  %vm1689_vm7 = vmor %vm1687_vm4, %vm1688_vm3  ;;  %v1706_v40 = vand.u32 2147483647, %v3970_v46  ;;  %v1708_v45 = vand.u32 2147483648, %v3970_v46 }
 0x25b   : > { %2832 = vpow2.f32 %v2577_v47  ;;  %v1397_v57 = vadd.f32 %v1396_v1, %v3695_v55  ;;  %v1675_v63 = vsel %vm1674_vm0, %v2825_v27, %v1671_v56  ;;  %v1684_v10 = vsub.f32 1.0, %v1683_v61  ;;  %v1447_v47 = vpop.f32.mrf.mxu1 }
 0x25c   : > { %v3983_v58 = vadd.f32 %v1819_v53, %v1345_v50  ;;  %v1680_v11 = vsel %vm1677_vm1, %v1679_v5, %v1675_v63  ;;  %vm1702_vm9 = vweird.f32 %v3970_v46  ;;  %vm1707_vm11 = vcmp.eq.f32.partialorder %v1706_v40, 8.507059e+37 }
 0x25d   : > { %v3981_v2 = vadd.f32 %v1445_v52, %v1397_v57  ;;  %v1767_v13 = vsel %vm1452_vm2, %v1680_v11, %v3902_v22  ;;  %v1685_v21 = vmul.f32 %v2829_v54, %v1684_v10 }
 0x25e   : > { %v1851_v17 = vmul.f32 %v3983_v58, %v3983_v58  ;;  %v1783_v20 = vpack.c.bf16 %v1767_v13, %v1767_v13 }
 0x25f   : > { %v2578_v14 = vmul.f32 -1.442695, %v3981_v2  ;;  %v1298_v24 = vpop.f32.mrf.mxu2  ;;  %v1686_v12 = vadd.f32 %v2829_v54, %v1685_v21 }
 0x260   : > { %v2831_v15 = vpop.eup %2830  ;;  %v1299_v22 = vadd.f32 %v1298_v24, %v3700_v60  ;;  %1880 = vadd.xlane.f32.xlu1 %v1851_v17  ;;  %1800 = vst.msk [vmem:[%s3756_s22 + $0x28] sm:$0xf] %vm1789_vm5, %v1783_v20 }
 0x261   : > { %v2833_v16 = vpop.eup %2832  ;;  %v1698_v19 = vmul.f32 %v2831_v15, %v3970_v46  ;;  %2834 = vpow2.f32 %v2578_v14  ;;  %v1690_v36 = vsel %vm1689_vm7, %v2829_v54, %v1686_v12  ;;  %vm1703_vm8 = vweird.f32 %v2831_v15  ;;  %v1349_v10 = vpop.f32.mrf.mxu3 }
 0x262   : > { %v3998_v27 = vadd.f32 1.0, %v2833_v16  ;;  %v1398_v28 = vpop.f32.mrf.mxu0  ;;  %v1348_v31 = vadd.f32 %v1347_v26, %v1299_v22  ;;  %v1695_v25 = vsel %vm1692_vm6, %v1694_v29, %v1690_v36  ;;  %vm1704_vm10 = vmor %vm1702_vm9, %vm1703_vm8  ;;  %v1709_v54 = vor.u32 1.1754944e-38, %v1708_v45 }
 0x263   : > { %v1699_v30 = vsub.f32 1.0, %v1698_v19  ;;  %v1399_v34 = vadd.f32 %v1398_v28, %v3695_v55  ;;  %v1768_v38 = vsel %vm1452_vm2, %v1695_v25, %v3924_v43 }
 0x264   : > { %2836 = vrcp.f32 %v3998_v27  ;;  %v4010_v55 = vadd.f32 %v1820_v35, %v1348_v31  ;;  %v1784_v52 = vpack.c.bf16 %v1768_v38, %v1768_v38  ;;  %vm1717_vm13 = vweird.f32 %v3998_v27 }
 0x265   : > { %v1700_v48 = vmul.f32 %v2831_v15, %v1699_v30  ;;  %v4005_v49 = vadd.f32 %v1447_v47, %v1399_v34 }
 0x266   : > { %v1852_v57 = vmul.f32 %v4010_v55, %v4010_v55  ;;  %1801 = vst.msk [vmem:[%s3756_s22 + $0x2c] sm:$0xf] %vm1789_vm5, %v1784_v52 }
 0x267   : > { %v2835_v51 = vpop.eup %2834  ;;  %v1701_v1 = vadd.f32 %v2831_v15, %v1700_v48  ;;  %v2579_v53 = vmul.f32 -1.442695, %v4005_v49  ;;  %v1300_v50 = vpop.f32.mrf.mxu2 }
 0x268   : > { %v4014_v56 = vadd.f32 1.0, %v2835_v51  ;;  %v1301_v5 = vadd.f32 %v1300_v50, %v3700_v60  ;;  %1882 = vadd.xlane.f32.xlu2 %v1852_v57  ;;  %v1723_v60 = vand.u32 2147483648, %v3998_v27 }
 0x269   : > { %v1705_v43 = vsel %vm1704_vm10, %v2831_v15, %v1701_v1  ;;  %2838 = vpow2.f32 %v2579_v53 }
 0x26a   : > { %v2837_v46 = vpop.eup %2836  ;;  %v1710_v61 = vsel %vm1707_vm11, %v1709_v54, %v1705_v43  ;;  %2840 = vrcp.f32 %v4014_v56  ;;  %v1350_v3 = vadd.f32 %v1349_v10, %v1301_v5  ;;  %v1724_v28 = vor.u32 1.1754944e-38, %v1723_v60 }
 0x26b   : > { %v1769_v63 = vsel %vm1452_vm2, %v1710_v61, %v3941_v4  ;;  %v1713_v11 = vmul.f32 %v2837_v46, %v3998_v27  ;;  %v1855_v14 = vpop.xlane.xlu0 %1854  ;;  %vm1718_vm12 = vweird.f32 %v2837_v46  ;;  %v1721_v4 = vand.u32 2147483647, %v3998_v27 }
 0x26c   : > { %v1785_v13 = vpack.c.bf16 %v1769_v63, %v1769_v63  ;;  %v4027_v15 = vmax.f32 %v1855_v14, 1e-24  ;;  %v4032_v20 = vadd.f32 %v1821_v59, %v1350_v3  ;;  %vm1719_vm14 = vmor %vm1717_vm13, %vm1718_vm12  ;;  %v1736_v34 = vand.u32 2147483647, %v4014_v56 }
 0x26d   : > { %v1714_v17 = vsub.f32 1.0, %v1713_v11  ;;  %vm1722_vm15 = vcmp.eq.f32.partialorder %v1721_v4, 8.507059e+37  ;;  %v1738_v35 = vand.u32 2147483648, %v4014_v56  ;;  %vm1732_vm1 = vweird.f32 %v4014_v56 }
 0x26e   : > { %1802 = vst.msk [vmem:[%s3756_s22 + $0x30] sm:$0xf] %vm1789_vm5, %v1785_v13  ;;  %2842 = vrsqrt.f32 %v4027_v15  ;;  %v1853_v26 = vmul.f32 %v4032_v20, %v4032_v20  ;;  %vm1737_vm4 = vcmp.eq.f32.partialorder %v1736_v34, 8.507059e+37  ;;  %vm1908_vm11 = vweird.f32 %v4027_v15 }
 0x26f   : > { %v2839_v21 = vpop.eup %2838  ;;  %v1715_v24 = vmul.f32 %v2837_v46, %v1714_v17  ;;  %v1739_v52 = vor.u32 1.1754944e-38, %v1738_v35 }
 0x270   : > { %v2841_v16 = vpop.eup %2840  ;;  %v1516_v19 = vadd.f32 1.0, %v2839_v21  ;;  %1884 = vadd.xlane.f32.xlu0 %v1853_v26 }
 0x271   : > { %v1716_v22 = vadd.f32 %v2837_v46, %v1715_v24  ;;  %v1728_v12 = vmul.f32 %v2841_v16, %v4014_v56  ;;  %vm1733_vm0 = vweird.f32 %v2841_v16 }
 0x272   : > { %2844 = vrcp.f32 %v1516_v19  ;;  %vm1734_vm3 = vmor %vm1732_vm1, %vm1733_vm0  ;;  %v1753_v56 = vand.u32 2147483648, %v1516_v19  ;;  %v1751_v11 = vand.u32 2147483647, %v1516_v19  ;;  %vm1747_vm7 = vweird.f32 %v1516_v19 }
 0x273   : > { %v1720_v29 = vsel %vm1719_vm14, %v2837_v46, %v1716_v22  ;;  %v1729_v30 = vsub.f32 1.0, %v1728_v12  ;;  %v1857_v36 = vpop.xlane.xlu0 %1856 }
 0x274   : > { %v1725_v31 = vsel %vm1722_vm15, %v1724_v28, %v1720_v29  ;;  %v2843_v40 = vpop.eup %2842  ;;  %v1887_v47 = vmax.f32 %v1857_v36, 1e-24  ;;  %v1754_v14 = vor.u32 1.1754944e-38, %v1753_v56  ;;  %vm1752_vm9 = vcmp.eq.f32.partialorder %v1751_v11, 8.507059e+37 }
 0x275   : > { %v1770_v27 = vsel %vm1452_vm2, %v1725_v31, %v3962_v33  ;;  %v1730_v45 = vmul.f32 %v2841_v16, %v1729_v30  ;;  %v1903_v48 = vmul.f32 %v2843_v40, %v4027_v15  ;;  %vm1909_vm10 = vweird.f32 %v2843_v40 }
 0x276   : > { %v1786_v25 = vpack.c.bf16 %v1770_v27, %v1770_v27  ;;  %2846 = vrsqrt.f32 %v1887_v47  ;;  %vm1910_vm13 = vmor %vm1908_vm11, %vm1909_vm10  ;;  %vm1918_vm14 = vweird.f32 %v1887_v47 }
 0x277   : > { %v1731_v38 = vadd.f32 %v2841_v16, %v1730_v45  ;;  %v1904_v1 = vmul.f32 %v2843_v40, %v1903_v48 }
 0x278   : > { %v2845_v51 = vpop.eup %2844  ;;  %1803 = vst.msk [vmem:[%s3756_s22 + $0x34] sm:$0xf] %vm1789_vm5, %v1786_v25 }
 0x279   : > { %v1735_v53 = vsel %vm1734_vm3, %v2841_v16, %v1731_v38  ;;  %v1743_v33 = vmul.f32 %v2845_v51, %v1516_v19  ;;  %v1905_v50 = vmul.f32 0.5, %v1904_v1  ;;  %vm1748_vm6 = vweird.f32 %v2845_v51 }
 0x27a   : > { %v1740_v54 = vsel %vm1737_vm4, %v1739_v52, %v1735_v53  ;;  %vm1749_vm8 = vmor %vm1747_vm7, %vm1748_vm6 }
 0x27b   : > { %v1771_v57 = vsel %vm1452_vm2, %v1740_v54, %v3981_v2  ;;  %v1744_v43 = vsub.f32 1.0, %v1743_v33  ;;  %v1859_v46 = vpop.xlane.xlu1 %1858  ;;  %v1906_v59 = vsub.f32 1.5, %v1905_v50 }
 0x27c   : > { %v1787_v5 = vpack.c.bf16 %v1771_v57, %v1771_v57  ;;  %v2847_v61 = vpop.eup %2846  ;;  %v1888_v10 = vmax.f32 %v1859_v46, 1e-24 }
 0x27d   : > { %v1745_v63 = vmul.f32 %v2845_v51, %v1744_v43  ;;  %v1913_v13 = vmul.f32 %v2847_v61, %v1887_v47  ;;  %v1907_v21 = vmul.f32 %v2843_v40, %v1906_v59  ;;  %vm1919_vm12 = vweird.f32 %v2847_v61 }
 0x27e   : > { %1804 = vst.msk [vmem:[%s3756_s22 + $0x38] sm:$0xf] %vm1789_vm5, %v1787_v5  ;;  %2848 = vrsqrt.f32 %v1888_v10  ;;  %vm1920_vm15 = vmor %vm1918_vm14, %vm1919_vm12 }
 0x27f   : > { %v1746_v3 = vadd.f32 %v2845_v51, %v1745_v63  ;;  %v1914_v2 = vmul.f32 %v2847_v61, %v1913_v13  ;;  %v1911_v22 = vsel %vm1910_vm13, %v2843_v40, %v1907_v21 }
 0x280   : > { %v2062_v30 = vmul.f32 %v1911_v22, %v3708_v9 }
 0x281   : > { %v1750_v17 = vsel %vm1749_vm8, %v2845_v51, %v1746_v3  ;;  %v1915_v24 = vmul.f32 0.5, %v1914_v2 }
 0x282   : > { %v1755_v60 = vsel %vm1752_vm9, %v1754_v14, %v1750_v17 }
 0x283   : > { %v1772_v4 = vsel %vm1452_vm2, %v1755_v60, %v4005_v49  ;;  %v1916_v19 = vsub.f32 1.5, %v1915_v24  ;;  %v1861_v49 = vpop.xlane.xlu1 %1860 }
 0x284   : > { %v1788_v16 = vpack.c.bf16 %v1772_v4, %v1772_v4  ;;  %v2849_v26 = vpop.eup %2848  ;;  %v1889_v31 = vmax.f32 %v1861_v49, 1e-24 }
 0x285   : > { %v1917_v12 = vmul.f32 %v2847_v61, %v1916_v19  ;;  %v1923_v28 = vmul.f32 %v2849_v26, %v1888_v10  ;;  %vm1929_vm2 = vweird.f32 %v2849_v26 }
 0x286   : > { %1805 = vst.msk [vmem:[%s3756_s22 + $0x3c] sm:$0xf] %vm1789_vm5, %v1788_v16  ;;  %2850 = vrsqrt.f32 %v1889_v31  ;;  %vm1928_vm5 = vweird.f32 %v1888_v10  ;;  %vm1938_vm3 = vweird.f32 %v1889_v31 }
 0x287   : > { %v1921_v29 = vsel %vm1920_vm15, %v2847_v61, %v1917_v12  ;;  %v1924_v34 = vmul.f32 %v2849_v26, %v1923_v28  ;;  %vm1930_vm1 = vmor %vm1928_vm5, %vm1929_vm2 }
 0x288   : > { %v2063_v39 = vmul.f32 %v1921_v29, %v3719_v23 }
 0x289   : > { %v1925_v40 = vmul.f32 0.5, %v1924_v34 }
 0x28a   : > { %v2670_v15 = vpack.c.bf16 %v2063_v39, %v2062_v30 }
 0x28b   : > { %v1863_v35 = vpop.xlane.xlu2 %1862  ;;  %v1926_v45 = vsub.f32 1.5, %v1925_v40 }
 0x28c   : > { %2671 = vst [vmem:[%s4063_s23] sm:$0xff] %v2670_v15   ;;  %v1890_v36 = vmax.f32 %v1863_v35, 1e-24  ;;  %v2851_v27 = vpop.eup %2850 }
 0x28d   : > { %v1933_v47 = vmul.f32 %v2851_v27, %v1889_v31  ;;  %v1927_v48 = vmul.f32 %v2849_v26, %v1926_v45  ;;  %vm1939_vm0 = vweird.f32 %v2851_v27 }
 0x28e   : > { %2852 = vrsqrt.f32 %v1890_v36  ;;  %vm1940_vm4 = vmor %vm1938_vm3, %vm1939_vm0  ;;  %vm1948_vm7 = vweird.f32 %v1890_v36 }
 0x28f   : > { %v1934_v25 = vmul.f32 %v2851_v27, %v1933_v47  ;;  %v1931_v33 = vsel %vm1930_vm1, %v2849_v26, %v1927_v48 }
 0x290   : > { %v2064_v56 = vmul.f32 %v1931_v33, %v3742_v44 }
 0x291   : > { %v1935_v38 = vmul.f32 0.5, %v1934_v25 }
 0x293   : > { %v1865_v23 = vpop.xlane.xlu2 %1864  ;;  %v1936_v1 = vsub.f32 1.5, %v1935_v38 }
 0x294   : > { %v2853_v9 = vpop.eup %2852  ;;  %v1891_v52 = vmax.f32 %v1865_v23, 1e-24 }
 0x295   : > { %v1943_v51 = vmul.f32 %v2853_v9, %v1890_v36  ;;  %v1937_v54 = vmul.f32 %v2851_v27, %v1936_v1  ;;  %vm1949_vm6 = vweird.f32 %v2853_v9 }
 0x296   : > { %2854 = vrsqrt.f32 %v1891_v52  ;;  %vm1950_vm9 = vmor %vm1948_vm7, %vm1949_vm6  ;;  %vm1958_vm10 = vweird.f32 %v1891_v52 }
 0x297   : > { %v1944_v53 = vmul.f32 %v2853_v9, %v1943_v51  ;;  %v1941_v43 = vsel %vm1940_vm4, %v2851_v27, %v1937_v54 }
 0x298   : > { %v2065_v46 = vmul.f32 %v1941_v43, %v3774_v18 }
 0x299   : > { %v1945_v50 = vmul.f32 0.5, %v1944_v53 }
 0x29a   : > { %v2675_v63 = vpack.c.bf16 %v2065_v46, %v2064_v56 }
 0x29b   : > { %v1867_v57 = vpop.xlane.xlu0 %1866  ;;  %v1946_v11 = vsub.f32 1.5, %v1945_v50 }
 0x29c   : > { %v1892_v5 = vmax.f32 %v1867_v57, 1e-24  ;;  %v2855_v61 = vpop.eup %2854  ;;  %2707 = vst [vmem:[%s4063_s23 + $0x8] sm:$0xff] %v2675_v63  }
 0x29d   : > { %v1953_v10 = vmul.f32 %v2855_v61, %v1891_v52  ;;  %v1947_v13 = vmul.f32 %v2853_v9, %v1946_v11  ;;  %vm1959_vm8 = vweird.f32 %v2855_v61 }
 0x29e   : > { %2856 = vrsqrt.f32 %v1892_v5  ;;  %vm1960_vm11 = vmor %vm1958_vm10, %vm1959_vm8  ;;  %vm1968_vm13 = vweird.f32 %v1892_v5 }
 0x29f   : > { %v1954_v59 = vmul.f32 %v2855_v61, %v1953_v10  ;;  %v1951_v18 = vsel %vm1950_vm9, %v2853_v9, %v1947_v13 }
 0x2a0   : > { %v2066_v16 = vmul.f32 %v1951_v18, %v3790_v8 }
 0x2a1   : > { %v1955_v3 = vmul.f32 0.5, %v1954_v59 }
 0x2a3   : > { %v1869_v2 = vpop.xlane.xlu1 %1868  ;;  %v1956_v17 = vsub.f32 1.5, %v1955_v3 }
 0x2a4   : > { %v2857_v14 = vpop.eup %2856  ;;  %v1893_v44 = vmax.f32 %v1869_v2, 1e-24 }
 0x2a5   : > { %v1963_v60 = vmul.f32 %v2857_v14, %v1892_v5  ;;  %v1957_v21 = vmul.f32 %v2855_v61, %v1956_v17  ;;  %vm1969_vm12 = vweird.f32 %v2857_v14 }
 0x2a6   : > { %2858 = vrsqrt.f32 %v1893_v44  ;;  %vm1970_vm15 = vmor %vm1968_vm13, %vm1969_vm12  ;;  %vm1978_vm2 = vweird.f32 %v1893_v44 }
 0x2a7   : > { %v1964_v24 = vmul.f32 %v2857_v14, %v1963_v60  ;;  %v1961_v4 = vsel %vm1960_vm11, %v2855_v61, %v1957_v21 }
 0x2a8   : > { %v2067_v19 = vmul.f32 %v1961_v4, %v3816_v7 }
 0x2a9   : > { %v1965_v26 = vmul.f32 0.5, %v1964_v24 }
 0x2aa   : > { %v2680_v22 = vpack.c.bf16 %v2067_v19, %v2066_v16 }
 0x2ab   : > { %v1871_v28 = vpop.xlane.xlu2 %1870  ;;  %v1966_v29 = vsub.f32 1.5, %v1965_v26 }
 0x2ac   : > { %v2859_v12 = vpop.eup %2858  ;;  %2708 = vst [vmem:[%s4063_s23 + $0x10] sm:$0xff] %v2680_v22   ;;  %v1894_v39 = vmax.f32 %v1871_v28, 1e-24 }
 0x2ad   : > { %v1973_v30 = vmul.f32 %v2859_v12, %v1893_v44  ;;  %v1967_v31 = vmul.f32 %v2857_v14, %v1966_v29  ;;  %vm1979_vm14 = vweird.f32 %v2859_v12 }
 0x2ae   : > { %2860 = vrsqrt.f32 %v1894_v39  ;;  %vm1980_vm5 = vmor %vm1978_vm2, %vm1979_vm14  ;;  %vm1988_vm1 = vweird.f32 %v1894_v39 }
 0x2af   : > { %v1974_v49 = vmul.f32 %v2859_v12, %v1973_v30  ;;  %v1971_v36 = vsel %vm1970_vm15, %v2857_v14, %v1967_v31 }
 0x2b0   : > { %v2068_v47 = vmul.f32 %v1971_v36, %v3830_v32 }
 0x2b1   : > { %v1975_v15 = vmul.f32 0.5, %v1974_v49 }
 0x2b3   : > { %v1873_v34 = vpop.xlane.xlu0 %1872  ;;  %v1976_v35 = vsub.f32 1.5, %v1975_v15 }
 0x2b4   : > { %v1895_v8 = vmax.f32 %v1873_v34, 1e-24  ;;  %v2861_v7 = vpop.eup %2860 }
 0x2b5   : > { %v1977_v40 = vmul.f32 %v2859_v12, %v1976_v35  ;;  %v1983_v27 = vmul.f32 %v2861_v7, %v1894_v39  ;;  %vm1989_vm0 = vweird.f32 %v2861_v7 }
 0x2b6   : > { %2862 = vrsqrt.f32 %v1895_v8  ;;  %vm1990_vm4 = vmor %vm1988_vm1, %vm1989_vm0  ;;  %vm1998_vm6 = vweird.f32 %v1895_v8 }
 0x2b7   : > { %v1981_v45 = vsel %vm1980_vm5, %v2859_v12, %v1977_v40  ;;  %v1984_v9 = vmul.f32 %v2861_v7, %v1983_v27 }
 0x2b8   : > { %v2069_v25 = vmul.f32 %v1981_v45, %v3854_v0 }
 0x2b9   : > { %v1985_v48 = vmul.f32 0.5, %v1984_v9 }
 0x2ba   : > { %v2685_v23 = vpack.c.bf16 %v2069_v25, %v2068_v47 }
 0x2bb   : > { %v1986_v51 = vsub.f32 1.5, %v1985_v48  ;;  %v1875_v1 = vpop.xlane.xlu1 %1874 }
 0x2bc   : > { %v2863_v38 = vpop.eup %2862  ;;  %2709 = vst [vmem:[%s4063_s23 + $0x18] sm:$0xff] %v2685_v23   ;;  %v1896_v53 = vmax.f32 %v1875_v1, 1e-24 }
 0x2bd   : > { %v1993_v52 = vmul.f32 %v2863_v38, %v1895_v8  ;;  %v1987_v54 = vmul.f32 %v2861_v7, %v1986_v51  ;;  %vm1999_vm3 = vweird.f32 %v2863_v38 }
 0x2be   : > { %2864 = vrsqrt.f32 %v1896_v53  ;;  %vm2000_vm7 = vmor %vm1998_vm6, %vm1999_vm3  ;;  %vm2008_vm9 = vweird.f32 %v1896_v53 }
 0x2bf   : > { %v1994_v33 = vmul.f32 %v2863_v38, %v1993_v52  ;;  %v1991_v43 = vsel %vm1990_vm4, %v2861_v7, %v1987_v54 }
 0x2c0   : > { %v2070_v63 = vmul.f32 %v1991_v43, %v3879_v37 }
 0x2c1   : > { %v1995_v50 = vmul.f32 0.5, %v1994_v33 }
 0x2c3   : > { %v1996_v57 = vsub.f32 1.5, %v1995_v50  ;;  %v1877_v32 = vpop.xlane.xlu2 %1876 }
 0x2c4   : > { %v1897_v0 = vmax.f32 %v1877_v32, 1e-24  ;;  %v2865_v56 = vpop.eup %2864 }
 0x2c5   : > { %v1997_v5 = vmul.f32 %v2863_v38, %v1996_v57  ;;  %v2003_v61 = vmul.f32 %v2865_v56, %v1896_v53  ;;  %vm2009_vm8 = vweird.f32 %v2865_v56 }
 0x2c6   : > { %2866 = vrsqrt.f32 %v1897_v0  ;;  %vm2010_vm11 = vmor %vm2008_vm9, %vm2009_vm8  ;;  %vm2018_vm12 = vweird.f32 %v1897_v0 }
 0x2c7   : > { %v2001_v46 = vsel %vm2000_vm7, %v2863_v38, %v1997_v5  ;;  %v2004_v10 = vmul.f32 %v2865_v56, %v2003_v61 }
 0x2c8   : > { %v2071_v11 = vmul.f32 %v2001_v46, %v3896_v62 }
 0x2c9   : > { %v2005_v13 = vmul.f32 0.5, %v2004_v10 }
 0x2ca   : > { %v2690_v59 = vpack.c.bf16 %v2071_v11, %v2070_v63 }
 0x2cb   : > { %v2006_v14 = vsub.f32 1.5, %v2005_v13  ;;  %v1879_v17 = vpop.xlane.xlu0 %1878 }
 0x2cc   : > { %v2867_v3 = vpop.eup %2866  ;;  %2710 = vst [vmem:[%s4063_s23 + $0x20] sm:$0xff] %v2690_v59   ;;  %v1898_v60 = vmax.f32 %v1879_v17, 1e-24 }
 0x2cd   : > { %v2013_v2 = vmul.f32 %v2867_v3, %v1897_v0  ;;  %v2007_v18 = vmul.f32 %v2865_v56, %v2006_v14  ;;  %vm2019_vm10 = vweird.f32 %v2867_v3 }
 0x2ce   : > { %2868 = vrsqrt.f32 %v1898_v60  ;;  %vm2020_vm13 = vmor %vm2018_vm12, %vm2019_vm10  ;;  %vm2028_vm15 = vweird.f32 %v1898_v60 }
 0x2cf   : > { %v2014_v44 = vmul.f32 %v2867_v3, %v2013_v2  ;;  %v2011_v4 = vsel %vm2010_vm11, %v2865_v56, %v2007_v18 }
 0x2d0   : > { %v2072_v12 = vmul.f32 %v2011_v4, %v3920_v41 }
 0x2d1   : > { %v2015_v21 = vmul.f32 0.5, %v2014_v44 }
 0x2d3   : > { %v2016_v24 = vsub.f32 1.5, %v2015_v21  ;;  %v1881_v37 = vpop.xlane.xlu1 %1880 }
 0x2d4   : > { %v1899_v62 = vmax.f32 %v1881_v37, 1e-24  ;;  %v2869_v19 = vpop.eup %2868 }
 0x2d5   : > { %v2017_v16 = vmul.f32 %v2867_v3, %v2016_v24  ;;  %v2023_v22 = vmul.f32 %v2869_v19, %v1898_v60  ;;  %vm2029_vm14 = vweird.f32 %v2869_v19 }
 0x2d6   : > { %2870 = vrsqrt.f32 %v1899_v62  ;;  %vm2030_vm5 = vmor %vm2028_vm15, %vm2029_vm14  ;;  %vm2038_vm0 = vweird.f32 %v1899_v62 }
 0x2d7   : > { %v2021_v26 = vsel %vm2020_vm13, %v2867_v3, %v2017_v16  ;;  %v2024_v29 = vmul.f32 %v2869_v19, %v2023_v22 }
 0x2d8   : > { %v2073_v28 = vmul.f32 %v2021_v26, %v3943_v6 }
 0x2d9   : > { %v2025_v39 = vmul.f32 0.5, %v2024_v29 }
 0x2da   : > { %v2695_v30 = vpack.c.bf16 %v2073_v28, %v2072_v12 }
 0x2db   : > { %v1883_v31 = vpop.xlane.xlu2 %1882  ;;  %v2026_v15 = vsub.f32 1.5, %v2025_v39 }
 0x2dc   : > { %v2871_v49 = vpop.eup %2870  ;;  %2711 = vst [vmem:[%s4063_s23 + $0x28] sm:$0xff] %v2695_v30   ;;  %v1900_v35 = vmax.f32 %v1883_v31, 1e-24 }
 0x2dd   : > { %v2033_v34 = vmul.f32 %v2871_v49, %v1899_v62  ;;  %v2027_v7 = vmul.f32 %v2869_v19, %v2026_v15  ;;  %vm2039_vm2 = vweird.f32 %v2871_v49 }
 0x2de   : > { %2872 = vrsqrt.f32 %v1900_v35  ;;  %vm2040_vm1 = vmor %vm2038_vm0, %vm2039_vm2  ;;  %vm2048_vm4 = vweird.f32 %v1900_v35 }
 0x2df   : > { %v2034_v8 = vmul.f32 %v2871_v49, %v2033_v34  ;;  %v2031_v27 = vsel %vm2030_vm5, %v2869_v19, %v2027_v7 }
 0x2e0   : > { %v2074_v23 = vmul.f32 %v2031_v27, %v3966_v42 }
 0x2e1   : > { %v2035_v36 = vmul.f32 0.5, %v2034_v8 }
 0x2e3   : > { %v2036_v40 = vsub.f32 1.5, %v2035_v36  ;;  %v1885_v41 = vpop.xlane.xlu0 %1884 }
 0x2e4   : > { %v2873_v6 = vpop.eup %2872  ;;  %v1901_v47 = vmax.f32 %v1885_v41, 1e-24 }
 0x2e5   : > { %v2037_v45 = vmul.f32 %v2871_v49, %v2036_v40  ;;  %v2043_v25 = vmul.f32 %v2873_v6, %v1900_v35  ;;  %vm2049_vm3 = vweird.f32 %v2873_v6 }
 0x2e6   : > { %2874 = vrsqrt.f32 %v1901_v47  ;;  %vm2050_vm7 = vmor %vm2048_vm4, %vm2049_vm3  ;;  %vm2058_vm8 = vweird.f32 %v1901_v47 }
 0x2e7   : > { %v2041_v9 = vsel %vm2040_vm1, %v2871_v49, %v2037_v45  ;;  %v2044_v38 = vmul.f32 %v2873_v6, %v2043_v25 }
 0x2e8   : > { %v2075_v48 = vmul.f32 %v2041_v9, %v3983_v58 }
 0x2e9   : > { %v2045_v52 = vmul.f32 0.5, %v2044_v38 }
 0x2ea   : > { %v2700_v51 = vpack.c.bf16 %v2075_v48, %v2074_v23 }
 0x2eb   : > { %v2046_v53 = vsub.f32 1.5, %v2045_v52 }
 0x2ec   : > { %2712 = vst [vmem:[%s4063_s23 + $0x30] sm:$0xff] %v2700_v51   ;;  %v2875_v1 = vpop.eup %2874 }
 0x2ed   : > { %v2053_v33 = vmul.f32 %v2875_v1, %v1901_v47  ;;  %v2047_v50 = vmul.f32 %v2873_v6, %v2046_v53  ;;  %vm2059_vm6 = vweird.f32 %v2875_v1 }
 0x2ee   : > { %vm2060_vm9 = vmor %vm2058_vm8, %vm2059_vm6 }
 0x2ef   : > { %v2054_v54 = vmul.f32 %v2875_v1, %v2053_v33  ;;  %v2051_v42 = vsel %vm2050_vm7, %v2873_v6, %v2047_v50 }
 0x2f0   : > { %v2076_v43 = vmul.f32 %v2051_v42, %v4010_v55 }
 0x2f1   : > { %v2055_v57 = vmul.f32 0.5, %v2054_v54 }
 0x2f3   : > { %v2056_v32 = vsub.f32 1.5, %v2055_v57 }
 0x2f5   : > { %v2057_v58 = vmul.f32 %v2875_v1, %v2056_v32 }
 0x2f7   : > { %v2061_v0 = vsel %vm2060_vm9, %v2875_v1, %v2057_v58 }
 0x2f8   : > { %v2077_v5 = vmul.f32 %v2061_v0, %v4032_v20 }
 0x2fa   : > { %v2705_v56 = vpack.c.bf16 %v2077_v5, %v2076_v43 }
 0x2fc   : > { %2713 = vst [vmem:[%s4063_s23 + $0x38] sm:$0xff] %v2705_v56  }
 0x2fd   : > { %2933 = shalt.err (!%p2930_p5)
}
 0x2fe   : > { %s2976_s26 = smov 64   ;;  %s2977_s23 = smov 4  }
 0x2ff   : > { %2732 = dma.vmem_to_hbm [thread:$0]  (%p3072_p10), %s2133_s14, 1024, %s2135_s9, %s2116_s25, %s2976_s26, %s2976_s26, %s2977_s23  }
 0x300 PF: > { %p2743_p7 = scmp.ge.s32.totalorder %s2972_s30, 2  ;;  %s2157_s19 = sand.u32 1, %s2960_s27  }
 0x301   : > { %s2158_s16 = scalar_lea.sflag [#allocation4], %s2157_s19 }
 0x302   : > { %p2739_p8 = pnand %p2743_p7, %p3076_p11 }
 0x304   : > { %p2740_p9 = pneg %p2739_p8 }
 0x306   : > { %2955 = dma.done.wait (%p2740_p9), %s2158_s16, 1024  }
 0x307   : > { %2957 = vsyncadd (%p2740_p9), %s2158_s16, 4294966272  ;;  %s4138_s24 = sld [smem:[#allocation8_spill]]  ;;  %p22_p1 = scmp.ge.s32.totalorder %s3048_s11, 6  }
 0x308   : > { %s4139_s29 = sld [smem:[#allocation9_spill]]  ;;  %s4140_s27 = smov %s2964_s28 }
 0x309   : > { %s4142_s30 = smov %s3048_s11  ;;  %24 = sbr.rel (!%p22_p1) target bundleno = 5 (0x5), region = 105 }
 0x30d   : > { %s4141_s28 = smov %s4138_s24 }
 0x30e   :  { %2164 = vsyncpa [#allocation3], 1 }
 0x30f   :  { %2166 = vsyncpa [#allocation3 + $0x1], 1 }
 0x310   :  { %2167 = vsyncpa [#allocation4], 1 }
 0x311   :  { %2169 = vsyncpa [#allocation4 + $0x1], 1 }

</bundles_post_ra>
